<compile_context>
chip_gen: v5e
topology: v5e:2x2
jax: 0.10.0
libtpu: 0.0.40
codegen_flags: <defaults>
</compile_context>

<pallas_src>
import functools

import numpy as np
import jax
import jax.numpy as jnp
from jax import lax
from jax.experimental import pallas as pl
from jax.experimental.pallas import tpu as pltpu


# ------------------------------ fused kernel --------------------------------

def _fused_body_kernel(xp_ref, w1_ref, b1_ref, w2_ref, b2_ref, sel_ref,
                       o_ref, c1_scr, im_scr, *, bb, flat1, wo1, pad_rows,
                       vp, c):
    f32, bf16 = jnp.float32, jnp.bfloat16
    c1o = w1_ref.shape[-1]                 # 16 conv1 channels
    rows = bb * flat1                      # GEMM M dimension (batch-blocked)

    # ---- conv1 (8x8, stride 4): one batched bf16 GEMM, bias + ReLU fused. --
    c1 = jnp.dot(xp_ref[...], w1_ref[...], preferred_element_type=f32)
    c1 = jnp.maximum(c1 + b1_ref[...], 0.0)                    # (rows, 16) f32

    # Stage conv1 (+ zero apron) per batch item so the conv2 im2col windows
    # never cross batch boundaries.
    c1_scr[:, 0:flat1, :] = c1.reshape(bb, flat1, c1o)
    c1_scr[:, flat1:flat1 + pad_rows, :] = jnp.zeros((bb, pad_rows, c1o), f32)

    # ---- conv2 im2col: 16 shifted-window lane-offset stores -> (bb,flat1,256)
    for kh in range(4):
        for kw in range(4):
            idx = 4 * kh + kw
            off = kh * wo1 + kw
            im_scr[:, :, idx * c1o:(idx + 1) * c1o] = \
                c1_scr[:, off:off + flat1, :]

    # ---- conv2 (4x4, stride 2, q|k|v|s fused along Cout): ONE K=256 GEMM. --
    lhs = im_scr[...].reshape(rows, 16 * c1o).astype(bf16)      # single cast
    slab = jnp.dot(lhs, w2_ref[...], preferred_element_type=f32) + b2_ref[...]
    slab_bf = slab.astype(bf16)                                 # (rows, 4c)

    # ---- compact to valid stride-2 rows + spatial transpose of keys --------
    # (one 0/1 selection matmul, block-diagonal over the batch block;
    #  rows [0:bb*vp) select valid rows, rows [bb*vp:2*bb*vp) select the
    #  spatially transposed valid rows).
    sel = jnp.dot(sel_ref[...], slab_bf, preferred_element_type=f32)
    bvp = bb * vp
    direct = sel[0:bvp]                    # [q | k | v | s] at valid positions
    transp = sel[bvp:2 * bvp]              # same, spatially transposed rows
    q = direct[:, 0 * c:1 * c]
    v = direct[:, 2 * c:3 * c]
    s = direct[:, 3 * c:4 * c]
    kt = transp[:, 1 * c:2 * c]

    # ---- attention: softmax over channels (torch dim=-3) * v * 2 + s (f32) -
    scores = q * kt
    m = jnp.max(scores, axis=-1, keepdims=True)
    e = jnp.exp(scores - m)
    p = e / jnp.sum(e, axis=-1, keepdims=True)
    o_ref[...] = (p * v * 2.0 + s).astype(o_ref.dtype)


# ------------------------------ host-side glue ------------------------------

def _default_batch_block(n):
    for d in (8, 4, 2, 1):
        if n % d == 0:
            return d
    return 1


def prepare_params(params, *, input_shape, batch_block):
    """One-time parameter prep (all constants, nothing per-forward):
      * fold 1/255 into conv1 weights, reorder to the space-to-depth patch
        layout, cast to bf16,
      * fuse q/k/v/s conv2 weights along Cout and flatten taps into K=256,
      * build the bf16 0/1 selector that compacts to the valid stride-2 rows
        and (second half) spatially transposes them, block-diagonal over the
        batch block."""
    w1, b1, wq, bq, wk, bk, wv, bv, ws, bs = params
    h, w, cin = input_shape
    assert h % 4 == 0 and w % 4 == 0
    hs, ws_ = h // 4, w // 4
    ho1, wo1 = hs - 1, ws_ - 1
    flat1 = ho1 * wo1
    ho2, wo2 = (ho1 - 4) // 2 + 1, (wo1 - 4) // 2 + 1
    assert ho2 == wo2, "square spatial output required by keys.transpose(-1,-2)"
    npos = ho2 * wo2
    vp = ((npos + 7) // 8) * 8
    bb = batch_block

    c1o = w1.shape[3]
    # conv1 weight -> (64*cin, 16): index [(2a+b)*16*cin + u*4*cin + v*cin + c]
    w1n = (np.asarray(w1, np.float32) / 255.0).reshape(2, 4, 2, 4, cin, c1o)
    w1n = w1n.transpose(0, 2, 1, 3, 4, 5).reshape(4 * 16 * cin, c1o)

    # q|k|v|s weights fused along Cout and flattened over taps -> (256, 128)
    w_all = np.concatenate([np.asarray(wq), np.asarray(wk),
                            np.asarray(wv), np.asarray(ws)], axis=-1)
    w2 = w_all.reshape(16 * w_all.shape[2], w_all.shape[3])
    b_all = np.concatenate([np.asarray(bq), np.asarray(bk),
                            np.asarray(bv), np.asarray(bs)],
                           axis=-1).reshape(1, -1)

    # Selection matrix: [ S_blockdiag ; St_blockdiag ]  (2*bb*vp, bb*flat1)
    sel = np.zeros((2 * bb * vp, bb * flat1), np.float32)
    for b in range(bb):
        for i in range(ho2):
            for j in range(wo2):
                p = i * wo2 + j
                sel[b * vp + p, b * flat1 + 2 * i * wo1 + 2 * j] = 1.0
                sel[bb * vp + b * vp + p, b * flat1 + 2 * j * wo1 + 2 * i] = 1.0

    return (jnp.asarray(w1n, jnp.bfloat16),
            jnp.asarray(np.asarray(b1).reshape(1, -1), jnp.float32),
            jnp.asarray(w2, jnp.bfloat16),
            jnp.asarray(b_all, jnp.float32),
            jnp.asarray(sel, jnp.bfloat16))


def _conv1_patches(x):
    """NHWC (N,H,W,C) -> (N, Ho1*Wo1, 64*C) conv1 patch matrix via
    space-to-depth(4) + four shifted windows (one small XLA producer fusion)."""
    n, h, w, c = x.shape
    assert h % 4 == 0 and w % 4 == 0, "spatial dims must be multiples of 4"
    hs, ws = h // 4, w // 4
    xs = x.reshape(n, hs, 4, ws, 4, c).transpose(0, 1, 3, 2, 4, 5)
    xs = xs.reshape(n, hs, ws, 16 * c)
    ho1, wo1 = hs - 1, ws - 1                  # == (H-8)//4 + 1
    blocks = [xs[:, a:a + ho1, b:b + wo1, :] for a in (0, 1) for b in (0, 1)]
    xp = jnp.concatenate(blocks, axis=-1)      # (N, Ho1, Wo1, 64*C)
    return xp.reshape(n, ho1 * wo1, 64 * c), ho1, wo1


def cnn_attention_body(x, prepped, *, batch_block=None):
    """x: (N, H, W, Cin) float32 NHWC (what the torch module receives)."""
    w1p, b1p, w2p, b2p, selp = prepped
    n, h, w, cin = x.shape
    if batch_block is None:
        batch_block = _default_batch_block(n)
    bb = batch_block
    assert n % bb == 0

    hs, ws_ = h // 4, w // 4
    ho1, wo1 = hs - 1, ws_ - 1
    flat1 = ho1 * wo1
    assert flat1 % 16 == 0
    ho2, wo2 = (ho1 - 4) // 2 + 1, (wo1 - 4) // 2 + 1
    assert ho2 == wo2
    npos = ho2 * wo2
    vp = ((npos + 7) // 8) * 8
    c = b2p.shape[-1] // 4
    assert selp.shape == (2 * bb * vp, bb * flat1), (selp.shape, bb, vp, flat1)

    xp, _, _ = _conv1_patches(x)
    xp = xp.reshape(n * flat1, -1).astype(jnp.bfloat16)   # lane-dense GEMM LHS
    assert xp.shape[-1] == w1p.shape[0]

    pad_rows = ((3 * wo1 + 3 + 15) // 16) * 16   # only rows conv2 can touch
    kernel = functools.partial(_fused_body_kernel, bb=bb, flat1=flat1, wo1=wo1,
                               pad_rows=pad_rows, vp=vp, c=c)

    def full(a):
        return pl.BlockSpec(a.shape, lambda i, _nd=a.ndim: (0,) * _nd)

    out = pl.pallas_call(
        kernel,
        out_shape=jax.ShapeDtypeStruct((n * vp, c), jnp.float32),
        grid=(n // bb,),
        in_specs=[
            pl.BlockSpec((bb * flat1, xp.shape[-1]), lambda i: (i, 0)),
            full(w1p), full(b1p), full(w2p), full(b2p), full(selp),
        ],
        out_specs=pl.BlockSpec((bb * vp, c), lambda i: (i, 0)),
        scratch_shapes=[
            pltpu.VMEM((bb, flat1 + pad_rows, w1p.shape[-1]), jnp.float32),
            pltpu.VMEM((bb, flat1, w2p.shape[0]), jnp.float32),
        ],
        compiler_params=pltpu.CompilerParams(
            dimension_semantics=("parallel",)),
    )(xp, w1p, b1p, w2p, b2p, selp)

    # Compact valid rows came straight out of the kernel; just drop the sublane
    # padding and permute to the module's NCHW output.
    y = out.reshape(n, vp, c)[:, :npos, :].reshape(n, ho2, wo2, c)
    return jnp.transpose(y, (0, 3, 1, 2))


# ------------------------------ pure-JAX ref --------------------------------

def reference(x, params):
    w1, b1, wq, bq, wk, bk, wv, bv, ws, bs = params
    dn = ("NHWC", "HWIO", "NHWC")
    h = lax.conv_general_dilated(x / 255.0, w1, (4, 4), "VALID",
                                 dimension_numbers=dn) + b1
    h = jnp.maximum(h, 0.0)

    def conv2(wgt, b):
        return lax.conv_general_dilated(h, wgt, (2, 2), "VALID",
                                        dimension_numbers=dn) + b

    q, k, v, s = conv2(wq, bq), conv2(wk, bk), conv2(wv, bv), conv2(ws, bs)
    kt = jnp.transpose(k, (0, 2, 1, 3))
    sm = jax.nn.softmax(q * kt, axis=-1)
    out = sm * v * 2.0 + s
    return jnp.transpose(out, (0, 3, 1, 2))


if __name__ == "__main__":
    key = jax.random.PRNGKey(0)
    ks = jax.random.split(key, 11)

    # NHWC input, 4 channels.  36 -> conv1(8,s4) -> 8x8 -> conv2(4,s2) -> 3x3.
    N, S, CIN = 2, 36, 4
    x = jax.random.uniform(ks[0], (N, S, S, CIN), jnp.float32, 0.0, 255.0)

    def winit(k, shape, scale=0.05):
        return scale * jax.random.normal(k, shape, jnp.float32)

    params = (
        winit(ks[1], (8, 8, CIN, 16)), winit(ks[2], (16,), 0.1),   # conv1
        winit(ks[3], (4, 4, 16, 32)),  winit(ks[4], (32,), 0.1),   # queries_nn
        winit(ks[5], (4, 4, 16, 32)),  winit(ks[6], (32,), 0.1),   # keys_nn
        winit(ks[7], (4, 4, 16, 32)),  winit(ks[8], (32,), 0.1),   # values_nn
        winit(ks[9], (4, 4, 16, 32)),  winit(ks[10], (32,), 0.1),  # sub_nn
    )

    bb = _default_batch_block(N)
    prepped = prepare_params(params, input_shape=(S, S, CIN), batch_block=bb)

    fwd = jax.jit(functools.partial(cnn_attention_body, batch_block=bb))
    out = jax.block_until_ready(fwd(x, prepped))

    assert out.shape == (N, 32, 3, 3), out.shape
    ref = reference(x, params)
    err = float(jnp.max(jnp.abs(out - ref)))
    # bf16 MXU operands (f32 accumulation) -> ~1e-3-level differences expected.
    assert err < 1e-2, f"max abs error too large: {err}"
    print("KERNEL_OK")
</pallas_src>

<mosaic_0001>
module attributes {stable_mosaic.version = 11 : i64} {
  func.func @_fused_body_kernel(%arg0: i32, %arg1: memref<128x256xbf16, #tpu.memory_space<vmem>>, %arg2: memref<256x16xbf16, #tpu.memory_space<vmem>>, %arg3: memref<1x16xf32, #tpu.memory_space<vmem>>, %arg4: memref<256x128xbf16, #tpu.memory_space<vmem>>, %arg5: memref<1x128xf32, #tpu.memory_space<vmem>>, %arg6: memref<64x128xbf16, #tpu.memory_space<vmem>>, %arg7: memref<32x32xf32, #tpu.memory_space<vmem>>, %arg8: memref<2x96x16xf32, #tpu.memory_space<vmem>>, %arg9: memref<2x64x256xf32, #tpu.memory_space<vmem>>) attributes {dimension_semantics = [#tpu.dimension_semantics<parallel>], iteration_bounds = array<i64: 1>, scalar_prefetch = 0 : i64, scratch_operands = 2 : i64, tpu.core_type = #tpu.core_type<tc>, window_params = [{transform_indices = @transform_0, window_bounds = array<i64: 128, 256>}, {pipeline_mode = #tpu.pipeline_mode<synchronous>, transform_indices = @transform_1, window_bounds = array<i64: 256, 16>}, {pipeline_mode = #tpu.pipeline_mode<synchronous>, transform_indices = @transform_2, window_bounds = array<i64: 1, 16>}, {pipeline_mode = #tpu.pipeline_mode<synchronous>, transform_indices = @transform_3, window_bounds = array<i64: 256, 128>}, {pipeline_mode = #tpu.pipeline_mode<synchronous>, transform_indices = @transform_4, window_bounds = array<i64: 1, 128>}, {pipeline_mode = #tpu.pipeline_mode<synchronous>, transform_indices = @transform_5, window_bounds = array<i64: 64, 128>}, {transform_indices = @transform_6, window_bounds = array<i64: 32, 32>}]} {
    %c0 = arith.constant 0 : index
    %c0_0 = arith.constant 0 : index
    %0 = vector.load %arg1[%c0, %c0_0] : memref<128x256xbf16, #tpu.memory_space<vmem>>, vector<128x256xbf16>
    %c0_1 = arith.constant 0 : index
    %c0_2 = arith.constant 0 : index
    %1 = vector.load %arg2[%c0_1, %c0_2] : memref<256x16xbf16, #tpu.memory_space<vmem>>, vector<256x16xbf16>
    %cst = arith.constant dense<0.000000e+00> : vector<128x16xf32>
    %2 = tpu.matmul %0, %1, %cst {dimension_numbers = #tpu.dot_dimension_numbers<[1], [0], [0], [1], [0, 0, 1, 1], [], []>} : vector<128x256xbf16>, vector<256x16xbf16>, vector<128x16xf32> -> vector<128x16xf32>
    %c0_3 = arith.constant 0 : index
    %c0_4 = arith.constant 0 : index
    %3 = vector.load %arg3[%c0_3, %c0_4] : memref<1x16xf32, #tpu.memory_space<vmem>>, vector<1x16xf32>
    %4 = vector.broadcast %3 : vector<1x16xf32> to vector<128x16xf32>
    %5 = arith.addf %2, %4 : vector<128x16xf32>
    %cst_5 = arith.constant 0.000000e+00 : f32
    %6 = vector.broadcast %cst_5 : f32 to vector<128x16xf32>
    %7 = arith.maximumf %5, %6 : vector<128x16xf32>
    %8 = vector.shape_cast %7 : vector<128x16xf32> to vector<2x64x16xf32>
    %c0_6 = arith.constant 0 : index
    %c0_7 = arith.constant 0 : index
    %c0_8 = arith.constant 0 : index
    %9 = vector.load %arg8[%c0_6, %c0_7, %c0_8] : memref<2x96x16xf32, #tpu.memory_space<vmem>>, vector<2x64x16xf32>
    tpu.vector_store %arg8[%c0_6, %c0_7, %c0_8], %8 {strides = array<i32>} : memref<2x96x16xf32, #tpu.memory_space<vmem>>, vector<2x64x16xf32>,
    %cst_9 = arith.constant 0.000000e+00 : f32
    %10 = vector.broadcast %cst_9 : f32 to vector<2x32x16xf32>
    %c0_10 = arith.constant 0 : index
    %c64 = arith.constant 64 : index
    %c0_11 = arith.constant 0 : index
    %11 = vector.load %arg8[%c0_10, %c64, %c0_11] : memref<2x96x16xf32, #tpu.memory_space<vmem>>, vector<2x32x16xf32>
    tpu.vector_store %arg8[%c0_10, %c64, %c0_11], %10 {strides = array<i32>} : memref<2x96x16xf32, #tpu.memory_space<vmem>>, vector<2x32x16xf32>,
    %c0_12 = arith.constant 0 : index
    %c0_13 = arith.constant 0 : index
    %c0_14 = arith.constant 0 : index
    %12 = vector.load %arg8[%c0_12, %c0_13, %c0_14] : memref<2x96x16xf32, #tpu.memory_space<vmem>>, vector<2x64x16xf32>
    %c0_15 = arith.constant 0 : index
    %c0_16 = arith.constant 0 : index
    %c0_17 = arith.constant 0 : index
    %13 = vector.load %arg9[%c0_15, %c0_16, %c0_17] : memref<2x64x256xf32, #tpu.memory_space<vmem>>, vector<2x64x16xf32>
    tpu.vector_store %arg9[%c0_15, %c0_16, %c0_17], %12 {strides = array<i32>} : memref<2x64x256xf32, #tpu.memory_space<vmem>>, vector<2x64x16xf32>,
    %c0_18 = arith.constant 0 : index
    %c1 = arith.constant 1 : index
    %c0_19 = arith.constant 0 : index
    %14 = vector.load %arg8[%c0_18, %c1, %c0_19] : memref<2x96x16xf32, #tpu.memory_space<vmem>>, vector<2x64x16xf32>
    %c0_20 = arith.constant 0 : index
    %c0_21 = arith.constant 0 : index
    %c16 = arith.constant 16 : index
    %15 = vector.load %arg9[%c0_20, %c0_21, %c16] : memref<2x64x256xf32, #tpu.memory_space<vmem>>, vector<2x64x16xf32>
    tpu.vector_store %arg9[%c0_20, %c0_21, %c16], %14 {strides = array<i32>} : memref<2x64x256xf32, #tpu.memory_space<vmem>>, vector<2x64x16xf32>,
    %c0_22 = arith.constant 0 : index
    %c2 = arith.constant 2 : index
    %c0_23 = arith.constant 0 : index
    %16 = vector.load %arg8[%c0_22, %c2, %c0_23] : memref<2x96x16xf32, #tpu.memory_space<vmem>>, vector<2x64x16xf32>
    %c0_24 = arith.constant 0 : index
    %c0_25 = arith.constant 0 : index
    %c32 = arith.constant 32 : index
    %17 = vector.load %arg9[%c0_24, %c0_25, %c32] : memref<2x64x256xf32, #tpu.memory_space<vmem>>, vector<2x64x16xf32>
    tpu.vector_store %arg9[%c0_24, %c0_25, %c32], %16 {strides = array<i32>} : memref<2x64x256xf32, #tpu.memory_space<vmem>>, vector<2x64x16xf32>,
    %c0_26 = arith.constant 0 : index
    %c3 = arith.constant 3 : index
    %c0_27 = arith.constant 0 : index
    %18 = vector.load %arg8[%c0_26, %c3, %c0_27] : memref<2x96x16xf32, #tpu.memory_space<vmem>>, vector<2x64x16xf32>
    %c0_28 = arith.constant 0 : index
    %c0_29 = arith.constant 0 : index
    %c48 = arith.constant 48 : index
    %19 = vector.load %arg9[%c0_28, %c0_29, %c48] : memref<2x64x256xf32, #tpu.memory_space<vmem>>, vector<2x64x16xf32>
    tpu.vector_store %arg9[%c0_28, %c0_29, %c48], %18 {strides = array<i32>} : memref<2x64x256xf32, #tpu.memory_space<vmem>>, vector<2x64x16xf32>,
    %c0_30 = arith.constant 0 : index
    %c8 = arith.constant 8 : index
    %c0_31 = arith.constant 0 : index
    %20 = vector.load %arg8[%c0_30, %c8, %c0_31] : memref<2x96x16xf32, #tpu.memory_space<vmem>>, vector<2x64x16xf32>
    %c0_32 = arith.constant 0 : index
    %c0_33 = arith.constant 0 : index
    %c64_34 = arith.constant 64 : index
    %21 = vector.load %arg9[%c0_32, %c0_33, %c64_34] : memref<2x64x256xf32, #tpu.memory_space<vmem>>, vector<2x64x16xf32>
    tpu.vector_store %arg9[%c0_32, %c0_33, %c64_34], %20 {strides = array<i32>} : memref<2x64x256xf32, #tpu.memory_space<vmem>>, vector<2x64x16xf32>,
    %c0_35 = arith.constant 0 : index
    %c9 = arith.constant 9 : index
    %c0_36 = arith.constant 0 : index
    %22 = vector.load %arg8[%c0_35, %c9, %c0_36] : memref<2x96x16xf32, #tpu.memory_space<vmem>>, vector<2x64x16xf32>
    %c0_37 = arith.constant 0 : index
    %c0_38 = arith.constant 0 : index
    %c80 = arith.constant 80 : index
    %23 = vector.load %arg9[%c0_37, %c0_38, %c80] : memref<2x64x256xf32, #tpu.memory_space<vmem>>, vector<2x64x16xf32>
    tpu.vector_store %arg9[%c0_37, %c0_38, %c80], %22 {strides = array<i32>} : memref<2x64x256xf32, #tpu.memory_space<vmem>>, vector<2x64x16xf32>,
    %c0_39 = arith.constant 0 : index
    %c10 = arith.constant 10 : index
    %c0_40 = arith.constant 0 : index
    %24 = vector.load %arg8[%c0_39, %c10, %c0_40] : memref<2x96x16xf32, #tpu.memory_space<vmem>>, vector<2x64x16xf32>
    %c0_41 = arith.constant 0 : index
    %c0_42 = arith.constant 0 : index
    %c96 = arith.constant 96 : index
    %25 = vector.load %arg9[%c0_41, %c0_42, %c96] : memref<2x64x256xf32, #tpu.memory_space<vmem>>, vector<2x64x16xf32>
    tpu.vector_store %arg9[%c0_41, %c0_42, %c96], %24 {strides = array<i32>} : memref<2x64x256xf32, #tpu.memory_space<vmem>>, vector<2x64x16xf32>,
    %c0_43 = arith.constant 0 : index
    %c11 = arith.constant 11 : index
    %c0_44 = arith.constant 0 : index
    %26 = vector.load %arg8[%c0_43, %c11, %c0_44] : memref<2x96x16xf32, #tpu.memory_space<vmem>>, vector<2x64x16xf32>
    %c0_45 = arith.constant 0 : index
    %c0_46 = arith.constant 0 : index
    %c112 = arith.constant 112 : index
    %27 = vector.load %arg9[%c0_45, %c0_46, %c112] : memref<2x64x256xf32, #tpu.memory_space<vmem>>, vector<2x64x16xf32>
    tpu.vector_store %arg9[%c0_45, %c0_46, %c112], %26 {strides = array<i32>} : memref<2x64x256xf32, #tpu.memory_space<vmem>>, vector<2x64x16xf32>,
    %c0_47 = arith.constant 0 : index
    %c16_48 = arith.constant 16 : index
    %c0_49 = arith.constant 0 : index
    %28 = vector.load %arg8[%c0_47, %c16_48, %c0_49] : memref<2x96x16xf32, #tpu.memory_space<vmem>>, vector<2x64x16xf32>
    %c0_50 = arith.constant 0 : index
    %c0_51 = arith.constant 0 : index
    %c128 = arith.constant 128 : index
    %29 = vector.load %arg9[%c0_50, %c0_51, %c128] : memref<2x64x256xf32, #tpu.memory_space<vmem>>, vector<2x64x16xf32>
    tpu.vector_store %arg9[%c0_50, %c0_51, %c128], %28 {strides = array<i32>} : memref<2x64x256xf32, #tpu.memory_space<vmem>>, vector<2x64x16xf32>,
    %c0_52 = arith.constant 0 : index
    %c17 = arith.constant 17 : index
    %c0_53 = arith.constant 0 : index
    %30 = vector.load %arg8[%c0_52, %c17, %c0_53] : memref<2x96x16xf32, #tpu.memory_space<vmem>>, vector<2x64x16xf32>
    %c0_54 = arith.constant 0 : index
    %c0_55 = arith.constant 0 : index
    %c144 = arith.constant 144 : index
    %31 = vector.load %arg9[%c0_54, %c0_55, %c144] : memref<2x64x256xf32, #tpu.memory_space<vmem>>, vector<2x64x16xf32>
    tpu.vector_store %arg9[%c0_54, %c0_55, %c144], %30 {strides = array<i32>} : memref<2x64x256xf32, #tpu.memory_space<vmem>>, vector<2x64x16xf32>,
    %c0_56 = arith.constant 0 : index
    %c18 = arith.constant 18 : index
    %c0_57 = arith.constant 0 : index
    %32 = vector.load %arg8[%c0_56, %c18, %c0_57] : memref<2x96x16xf32, #tpu.memory_space<vmem>>, vector<2x64x16xf32>
    %c0_58 = arith.constant 0 : index
    %c0_59 = arith.constant 0 : index
    %c160 = arith.constant 160 : index
    %33 = vector.load %arg9[%c0_58, %c0_59, %c160] : memref<2x64x256xf32, #tpu.memory_space<vmem>>, vector<2x64x16xf32>
    tpu.vector_store %arg9[%c0_58, %c0_59, %c160], %32 {strides = array<i32>} : memref<2x64x256xf32, #tpu.memory_space<vmem>>, vector<2x64x16xf32>,
    %c0_60 = arith.constant 0 : index
    %c19 = arith.constant 19 : index
    %c0_61 = arith.constant 0 : index
    %34 = vector.load %arg8[%c0_60, %c19, %c0_61] : memref<2x96x16xf32, #tpu.memory_space<vmem>>, vector<2x64x16xf32>
    %c0_62 = arith.constant 0 : index
    %c0_63 = arith.constant 0 : index
    %c176 = arith.constant 176 : index
    %35 = vector.load %arg9[%c0_62, %c0_63, %c176] : memref<2x64x256xf32, #tpu.memory_space<vmem>>, vector<2x64x16xf32>
    tpu.vector_store %arg9[%c0_62, %c0_63, %c176], %34 {strides = array<i32>} : memref<2x64x256xf32, #tpu.memory_space<vmem>>, vector<2x64x16xf32>,
    %c0_64 = arith.constant 0 : index
    %c24 = arith.constant 24 : index
    %c0_65 = arith.constant 0 : index
    %36 = vector.load %arg8[%c0_64, %c24, %c0_65] : memref<2x96x16xf32, #tpu.memory_space<vmem>>, vector<2x64x16xf32>
    %c0_66 = arith.constant 0 : index
    %c0_67 = arith.constant 0 : index
    %c192 = arith.constant 192 : index
    %37 = vector.load %arg9[%c0_66, %c0_67, %c192] : memref<2x64x256xf32, #tpu.memory_space<vmem>>, vector<2x64x16xf32>
    tpu.vector_store %arg9[%c0_66, %c0_67, %c192], %36 {strides = array<i32>} : memref<2x64x256xf32, #tpu.memory_space<vmem>>, vector<2x64x16xf32>,
    %c0_68 = arith.constant 0 : index
    %c25 = arith.constant 25 : index
    %c0_69 = arith.constant 0 : index
    %38 = vector.load %arg8[%c0_68, %c25, %c0_69] : memref<2x96x16xf32, #tpu.memory_space<vmem>>, vector<2x64x16xf32>
    %c0_70 = arith.constant 0 : index
    %c0_71 = arith.constant 0 : index
    %c208 = arith.constant 208 : index
    %39 = vector.load %arg9[%c0_70, %c0_71, %c208] : memref<2x64x256xf32, #tpu.memory_space<vmem>>, vector<2x64x16xf32>
    tpu.vector_store %arg9[%c0_70, %c0_71, %c208], %38 {strides = array<i32>} : memref<2x64x256xf32, #tpu.memory_space<vmem>>, vector<2x64x16xf32>,
    %c0_72 = arith.constant 0 : index
    %c26 = arith.constant 26 : index
    %c0_73 = arith.constant 0 : index
    %40 = vector.load %arg8[%c0_72, %c26, %c0_73] : memref<2x96x16xf32, #tpu.memory_space<vmem>>, vector<2x64x16xf32>
    %c0_74 = arith.constant 0 : index
    %c0_75 = arith.constant 0 : index
    %c224 = arith.constant 224 : index
    %41 = vector.load %arg9[%c0_74, %c0_75, %c224] : memref<2x64x256xf32, #tpu.memory_space<vmem>>, vector<2x64x16xf32>
    tpu.vector_store %arg9[%c0_74, %c0_75, %c224], %40 {strides = array<i32>} : memref<2x64x256xf32, #tpu.memory_space<vmem>>, vector<2x64x16xf32>,
    %c0_76 = arith.constant 0 : index
    %c27 = arith.constant 27 : index
    %c0_77 = arith.constant 0 : index
    %42 = vector.load %arg8[%c0_76, %c27, %c0_77] : memref<2x96x16xf32, #tpu.memory_space<vmem>>, vector<2x64x16xf32>
    %c0_78 = arith.constant 0 : index
    %c0_79 = arith.constant 0 : index
    %c240 = arith.constant 240 : index
    %43 = vector.load %arg9[%c0_78, %c0_79, %c240] : memref<2x64x256xf32, #tpu.memory_space<vmem>>, vector<2x64x16xf32>
    tpu.vector_store %arg9[%c0_78, %c0_79, %c240], %42 {strides = array<i32>} : memref<2x64x256xf32, #tpu.memory_space<vmem>>, vector<2x64x16xf32>,
    %c0_80 = arith.constant 0 : index
    %c0_81 = arith.constant 0 : index
    %c0_82 = arith.constant 0 : index
    %44 = vector.load %arg9[%c0_80, %c0_81, %c0_82] : memref<2x64x256xf32, #tpu.memory_space<vmem>>, vector<2x64x256xf32>
    %45 = vector.shape_cast %44 : vector<2x64x256xf32> to vector<128x256xf32>
    %46 = arith.truncf %45 : vector<128x256xf32> to vector<128x256xbf16>
    %c0_83 = arith.constant 0 : index
    %c0_84 = arith.constant 0 : index
    %47 = vector.load %arg4[%c0_83, %c0_84] : memref<256x128xbf16, #tpu.memory_space<vmem>>, vector<256x128xbf16>
    %cst_85 = arith.constant dense<0.000000e+00> : vector<128x128xf32>
    %48 = tpu.matmul %46, %47, %cst_85 {dimension_numbers = #tpu.dot_dimension_numbers<[1], [0], [0], [1], [0, 0, 1, 1], [], []>} : vector<128x256xbf16>, vector<256x128xbf16>, vector<128x128xf32> -> vector<128x128xf32>
    %c0_86 = arith.constant 0 : index
    %c0_87 = arith.constant 0 : index
    %49 = vector.load %arg5[%c0_86, %c0_87] : memref<1x128xf32, #tpu.memory_space<vmem>>, vector<1x128xf32>
    %50 = vector.broadcast %49 : vector<1x128xf32> to vector<128x128xf32>
    %51 = arith.addf %48, %50 : vector<128x128xf32>
    %52 = arith.truncf %51 : vector<128x128xf32> to vector<128x128xbf16>
    %c0_88 = arith.constant 0 : index
    %c0_89 = arith.constant 0 : index
    %53 = vector.load %arg6[%c0_88, %c0_89] : memref<64x128xbf16, #tpu.memory_space<vmem>>, vector<64x128xbf16>
    %cst_90 = arith.constant dense<0.000000e+00> : vector<64x128xf32>
    %54 = tpu.matmul %53, %52, %cst_90 {dimension_numbers = #tpu.dot_dimension_numbers<[1], [0], [0], [1], [0, 0, 1, 1], [], []>} : vector<64x128xbf16>, vector<128x128xbf16>, vector<64x128xf32> -> vector<64x128xf32>
    %55 = vector.extract_strided_slice %54 {offsets = [0, 0], sizes = [32, 128], strides = [1, 1]} : vector<64x128xf32> to vector<32x128xf32>
    %56 = vector.extract_strided_slice %54 {offsets = [32, 0], sizes = [32, 128], strides = [1, 1]} : vector<64x128xf32> to vector<32x128xf32>
    %57 = vector.extract_strided_slice %55 {offsets = [0, 0], sizes = [32, 32], strides = [1, 1]} : vector<32x128xf32> to vector<32x32xf32>
    %58 = vector.extract_strided_slice %55 {offsets = [0, 64], sizes = [32, 32], strides = [1, 1]} : vector<32x128xf32> to vector<32x32xf32>
    %59 = vector.extract_strided_slice %55 {offsets = [0, 96], sizes = [32, 32], strides = [1, 1]} : vector<32x128xf32> to vector<32x32xf32>
    %60 = vector.extract_strided_slice %56 {offsets = [0, 32], sizes = [32, 32], strides = [1, 1]} : vector<32x128xf32> to vector<32x32xf32>
    %61 = arith.mulf %57, %60 : vector<32x32xf32>
    %cst_91 = arith.constant dense<0xFF800000> : vector<32xf32>
    %62 = vector.multi_reduction <maximumf>, %61, %cst_91 [1] : vector<32x32xf32> to vector<32xf32>
    %63 = vector.shape_cast %62 : vector<32xf32> to vector<32x1xf32>
    %64 = vector.broadcast %63 : vector<32x1xf32> to vector<32x32xf32>
    %65 = arith.subf %61, %64 : vector<32x32xf32>
    %66 = math.exp %65 : vector<32x32xf32>
    %cst_92 = arith.constant dense<0.000000e+00> : vector<32xf32>
    %67 = vector.multi_reduction <add>, %66, %cst_92 [1] : vector<32x32xf32> to vector<32xf32>
    %68 = vector.shape_cast %67 : vector<32xf32> to vector<32x1xf32>
    %69 = vector.broadcast %68 : vector<32x1xf32> to vector<32x32xf32>
    %70 = arith.divf %66, %69 : vector<32x32xf32>
    %71 = arith.mulf %70, %58 : vector<32x32xf32>
    %cst_93 = arith.constant 2.000000e+00 : f32
    %72 = vector.broadcast %cst_93 : f32 to vector<32x32xf32>
    %73 = arith.mulf %71, %72 : vector<32x32xf32>
    %74 = arith.addf %73, %59 : vector<32x32xf32>
    %c0_94 = arith.constant 0 : index
    %c0_95 = arith.constant 0 : index
    %75 = vector.load %arg7[%c0_94, %c0_95] : memref<32x32xf32, #tpu.memory_space<vmem>>, vector<32x32xf32>
    tpu.vector_store %arg7[%c0_94, %c0_95], %74 {strides = array<i32>} : memref<32x32xf32, #tpu.memory_space<vmem>>, vector<32x32xf32>,
    return
  }
  func.func @transform_0(%arg0: i32) -> (i32, i32) {
    %c0_i32 = arith.constant 0 : i32
    %c0_i32_0 = arith.constant 0 : i32
    return %arg0, %c0_i32 : i32, i32
  }
  func.func @transform_1(%arg0: i32) -> (i32, i32) {
    %c0_i32 = arith.constant 0 : i32
    %c0_i32_0 = arith.constant 0 : i32
    %c0_i32_1 = arith.constant 0 : i32
    return %c0_i32, %c0_i32_0 : i32, i32
  }
  func.func @transform_2(%arg0: i32) -> (i32, i32) {
    %c0_i32 = arith.constant 0 : i32
    %c0_i32_0 = arith.constant 0 : i32
    %c0_i32_1 = arith.constant 0 : i32
    return %c0_i32, %c0_i32_0 : i32, i32
  }
  func.func @transform_3(%arg0: i32) -> (i32, i32) {
    %c0_i32 = arith.constant 0 : i32
    %c0_i32_0 = arith.constant 0 : i32
    %c0_i32_1 = arith.constant 0 : i32
    return %c0_i32, %c0_i32_0 : i32, i32
  }
  func.func @transform_4(%arg0: i32) -> (i32, i32) {
    %c0_i32 = arith.constant 0 : i32
    %c0_i32_0 = arith.constant 0 : i32
    %c0_i32_1 = arith.constant 0 : i32
    return %c0_i32, %c0_i32_0 : i32, i32
  }
  func.func @transform_5(%arg0: i32) -> (i32, i32) {
    %c0_i32 = arith.constant 0 : i32
    %c0_i32_0 = arith.constant 0 : i32
    %c0_i32_1 = arith.constant 0 : i32
    return %c0_i32, %c0_i32_0 : i32, i32
  }
  func.func @transform_6(%arg0: i32) -> (i32, i32) {
    %c0_i32 = arith.constant 0 : i32
    %c0_i32_0 = arith.constant 0 : i32
    return %arg0, %c0_i32 : i32, i32
  }
}

</mosaic_0001>

<bundles_post_ra>
// kernel: cnn_attention_body.1
= control target key start
LH: loop header
LB: loop body
LE: loop exit
PB: predicated region body
PF: predicated region fallthrough
CT: control target
= control target key end

     0   :  { %vm365_vm0 = vcmask 130048   ;;  %v2619_v57 = vmov 0.0   ;;  %s2620_s11 = smov 112   ;;  %s2621_s12 = smov 80   ;;  %vm502_vm1 = vcmask 261248   ;;  %vm599_vm2 = vcmask 392448   ;;  %s3787_s1 = inlined_call_operand.vmem [shape: bf16[256,16], index: 1, kind: input, shape index: {}]   ;;  %s3788_s2 = inlined_call_operand.vmem [shape: f32[1,16], index: 2, kind: input, shape index: {}]   ;;  %s3789_s0 = inlined_call_operand.vmem [shape: bf16[128,256], index: 0, kind: input, shape index: {}]   ;;  %s3790_s3 = inlined_call_operand.vmem [shape: bf16[256,128], index: 3, kind: input, shape index: {}]   ;;  %s3791_s4 = inlined_call_operand.vmem [shape: f32[1,128], index: 4, kind: input, shape index: {}]   ;;  %s3792_s5 = inlined_call_operand.vmem [shape: bf16[64,128], index: 5, kind: input, shape index: {}]   ;;  %s3793_s6 = inlined_call_operand.vmem [shape: f32[32,32], index: 6, kind: output, shape index: {}]  }
   0x1   :  { %v2548_v0 = vld [vmem:[%s3787_s1 + $0x38] sm:$0xff]  ;;  %v2547_v1 = vld [vmem:[%s3787_s1 + $0x30] sm:$0xff]  ;;  %v2546_v2 = vld [vmem:[%s3787_s1 + $0x28] sm:$0xff]  ;;  %382 = vst.msk [vmem:[#allocation2 + $0x40] sm:$0xff] %vm365_vm0, %v2619_v57  ;;  %s2622_s13 = smov 64   ;;  %s2623_s18 = smov 16  }
   0x2   :  { %2577 = vmatpush.bf16.msra.mxu1 %v2548_v0  ;;  %251 = vmatpush.bf16.msra.mxu0 %v2548_v0  ;;  %v2545_v3 = vld [vmem:[%s3787_s1 + $0x20] sm:$0xff]  ;;  %v2544_v4 = vld [vmem:[%s3787_s1 + $0x18] sm:$0xff]  ;;  %v2543_v5 = vld [vmem:[%s3787_s1 + $0x10] sm:$0xff]  ;;  %383 = vst.msk [vmem:[#allocation2 + $0x48] sm:$0xff] %vm365_vm0, %v2619_v57  ;;  %s2624_s19 = smov 96   ;;  %s2625_s20 = smov 32  }
   0x3   :  { %2578 = vmatpush.bf16.msra.mxu2 %v2548_v0  ;;  %v2542_v6 = vld [vmem:[%s3787_s1 + $0x8] sm:$0xff]  ;;  %v2541_v7 = vld [vmem:[%s3787_s1] sm:$0xff]  ;;  %v2359_v8 = vld [vmem:[%s3789_s0 + $0x50] sm:$0xf]  ;;  %384 = vst.msk [vmem:[#allocation2 + $0x50] sm:$0xff] %vm365_vm0, %v2619_v57  ;;  %vm696_vm3 = vcmask 523648  }
   0x4   :  { %v2536_v9 = vld [vmem:[%s3789_s0 + $0x54] sm:$0xf0]  ;;  %v2319_v10 = vld [vmem:[%s3789_s0] sm:$0xf]  ;;  %v2526_v11 = vld [vmem:[%s3789_s0 + $0x4] sm:$0xf0] }
   0x5   :  { %v2556_v12 = vld [vmem:[%s3787_s1 + $0x78] sm:$0xff]  ;;  %v2360_v13 = vor.u32 %v2536_v9, %v2359_v8  ;;  %v2320_v14 = vor.u32 %v2526_v11, %v2319_v10  ;;  %v2555_v15 = vld [vmem:[%s3787_s1 + $0x70] sm:$0xff]  ;;  %v2554_v16 = vld [vmem:[%s3787_s1 + $0x68] sm:$0xff]  ;;  %385 = vst.msk [vmem:[#allocation2 + $0x58] sm:$0xff] %vm365_vm0, %v2619_v57  ;;  %vm793_vm4 = vcmask 654848   ;;  %vm890_vm5 = vcmask 786048  }
   0x6   :  { %2579 = vmatpush.bf16.msra.mxu1 %v2547_v1  ;;  %252 = vmatpush.bf16.msra.mxu0 %v2547_v1  ;;  %v2553_v17 = vld [vmem:[%s3787_s1 + $0x60] sm:$0xff]  ;;  %v2538_v19 = vld [vmem:[%s3789_s0 + $0x64] sm:$0xf0]  ;;  %v2327_v20 = vld [vmem:[%s3789_s0 + $0x10] sm:$0xf]  ;;  %386 = vst.msk [vmem:[#allocation2 + $0xa0] sm:$0xff] %vm365_vm0, %v2619_v57 }
   0x7   :  { %2580 = vmatpush.bf16.msra.mxu2 %v2547_v1  ;;  %v2367_v18 = vld [vmem:[%s3789_s0 + $0x60] sm:$0xf]  ;;  %v2528_v21 = vld [vmem:[%s3789_s0 + $0x14] sm:$0xf0]  ;;  %v2551_v25 = vld [vmem:[%s3787_s1 + $0x50] sm:$0xff]  ;;  %387 = vst.msk [vmem:[#allocation2 + $0xa8] sm:$0xff] %vm365_vm0, %v2619_v57 }
   0x8   :  { %v2552_v22 = vld [vmem:[%s3787_s1 + $0x58] sm:$0xff]  ;;  %v2368_v23 = vor.u32 %v2538_v19, %v2367_v18  ;;  %v2328_v24 = vor.u32 %v2528_v21, %v2327_v20  ;;  %v2550_v26 = vld [vmem:[%s3787_s1 + $0x48] sm:$0xff]  ;;  %v2549_v27 = vld [vmem:[%s3787_s1 + $0x40] sm:$0xff]  ;;  %388 = vst.msk [vmem:[#allocation2 + $0xb0] sm:$0xff] %vm365_vm0, %v2619_v57  ;;  %vm987_vm6 = vcmask 917248   ;;  %vm1084_vm7 = vcmask 1048448  }
   0x9   :  { %v2525_v28 = vld [vmem:[%s3789_s0 + $0x4] sm:$0xf]  ;;  %v2321_v29 = vld [vmem:[%s3789_s0 + $0x8] sm:$0xf0]  ;;  %v2335_v30 = vld [vmem:[%s3789_s0 + $0x20] sm:$0xf] }
   0xa   :  { %2581 = vmatpush.bf16.msra.mxu1 %v2546_v2  ;;  %253 = vmatpush.bf16.msra.mxu0 %v2546_v2  ;;  %v2530_v31 = vld [vmem:[%s3789_s0 + $0x24] sm:$0xf0]  ;;  %v2324_v32 = vor.u32 %v2525_v28, %v2321_v29  ;;  %v2527_v34 = vld [vmem:[%s3789_s0 + $0x14] sm:$0xf]  ;;  %v2329_v35 = vld [vmem:[%s3789_s0 + $0x18] sm:$0xf0] }
   0xb   :  { %2582 = vmatpush.bf16.msra.mxu2 %v2546_v2  ;;  %v2336_v33 = vor.u32 %v2530_v31, %v2335_v30  ;;  %v2332_v36 = vor.u32 %v2527_v34, %v2329_v35  ;;  %v2343_v37 = vld [vmem:[%s3789_s0 + $0x30] sm:$0xf]  ;;  %v2532_v38 = vld [vmem:[%s3789_s0 + $0x34] sm:$0xf0]  ;;  %v2529_v40 = vld [vmem:[%s3789_s0 + $0x24] sm:$0xf] }
   0xc   :  { %v2344_v39 = vor.u32 %v2532_v38, %v2343_v37  ;;  %v2337_v41 = vld [vmem:[%s3789_s0 + $0x28] sm:$0xf0]  ;;  %v2351_v43 = vld [vmem:[%s3789_s0 + $0x40] sm:$0xf]  ;;  %v2534_v44 = vld [vmem:[%s3789_s0 + $0x44] sm:$0xf0] }
   0xd   :  { %v2340_v42 = vor.u32 %v2529_v40, %v2337_v41  ;;  %v2352_v45 = vor.u32 %v2534_v44, %v2351_v43  ;;  %v2531_v46 = vld [vmem:[%s3789_s0 + $0x34] sm:$0xf]  ;;  %v2345_v47 = vld [vmem:[%s3789_s0 + $0x38] sm:$0xf0]  ;;  %v2533_v49 = vld [vmem:[%s3789_s0 + $0x44] sm:$0xf] }
   0xe   :  { %2583 = vmatpush.bf16.msra.mxu1 %v2545_v3  ;;  %254 = vmatpush.bf16.msra.mxu0 %v2545_v3  ;;  %v2348_v48 = vor.u32 %v2531_v46, %v2345_v47  ;;  %v2353_v50 = vld [vmem:[%s3789_s0 + $0x48] sm:$0xf0]  ;;  %v2375_v52 = vld [vmem:[%s3789_s0 + $0x70] sm:$0xf]  ;;  %v2540_v53 = vld [vmem:[%s3789_s0 + $0x74] sm:$0xf0] }
   0xf   :  { %2584 = vmatpush.bf16.msra.mxu2 %v2545_v3  ;;  %v2356_v51 = vor.u32 %v2533_v49, %v2353_v50  ;;  %v2376_v54 = vor.u32 %v2540_v53, %v2375_v52  ;;  %v2535_v55 = vld [vmem:[%s3789_s0 + $0x54] sm:$0xf]  ;;  %v2361_v56 = vld [vmem:[%s3789_s0 + $0x58] sm:$0xf0]  ;;  %389 = vst.msk [vmem:[#allocation2 + $0xb8] sm:$0xff] %vm365_vm0, %v2619_v57  ;;  %v1714_v59 = vld [vmem:[#allocation2 + $0x43] sm:$0xff] }
  0x10   :  { %v2364_v58 = vor.u32 %v2535_v55, %v2361_v56  ;;  %1751 = vrot.lane.b32.xlu0 %v1714_v59, %s2620_s11  ;;  %v1522_v60 = vld [vmem:[#allocation2 + $0x41] sm:$0xff]  ;;  %v1140_v62 = vld [vmem:[#allocation2 + $0x49] sm:$0xff]  ;;  %vm2172_vm8 = vcmask 261120  }
  0x11   :  { %v1426_v61 = vld [vmem:[#allocation2 + $0x40] sm:$0xff]  ;;  %1559 = vrot.lane.b32.xlu2 %v1522_v60, %s2621_s12  ;;  %v2369_v0 = vld [vmem:[%s3789_s0 + $0x68] sm:$0xf0] }
  0x12   :  { %2585 = vmatpush.bf16.msra.mxu1 %v2544_v4  ;;  %255 = vmatpush.bf16.msra.mxu0 %v2544_v4  ;;  %1123 = vst.msk [vmem:[#allocation3 + $0x68] sm:$0xff] %vm365_vm0, %v1426_v61  ;;  %v2537_v63 = vld [vmem:[%s3789_s0 + $0x64] sm:$0xf]  ;;  %v1236_v8 = vld [vmem:[#allocation2 + $0x4a] sm:$0xff] }
  0x13   :  { %2586 = vmatpush.bf16.msra.mxu2 %v2544_v4  ;;  %1463 = vrot.lane.b32.xlu1 %v1426_v61, %s2622_s13  ;;  %v2372_v1 = vor.u32 %v2537_v63, %v2369_v0  ;;  %v2816_v3 = vld [vmem:[#allocation2 + $0x42] sm:$0xff] }
  0x16   :  { %2587 = vmatpush.bf16.msra.mxu1 %v2543_v5  ;;  %256 = vmatpush.bf16.msra.mxu0 %v2543_v5 }
  0x17   :  { %2588 = vmatpush.bf16.msra.mxu2 %v2543_v5  ;;  %v2539_v5 = vld [vmem:[%s3789_s0 + $0x74] sm:$0xf] }
  0x18   :  { %1179 = vrot.lane.b32.xlu0 %v1140_v62, %s2623_s18 }
  0x19   :  { %1177 = vrot.lane.b32.xlu2 %v1522_v60, %s2623_s18 }
  0x1a   :  { %2589 = vmatpush.bf16.msra.mxu1 %v2542_v6  ;;  %257 = vmatpush.bf16.msra.mxu0 %v2542_v6 }
  0x1b   :  { %2590 = vmatpush.bf16.msra.mxu2 %v2542_v6  ;;  %1655 = vrot.lane.b32.xlu1 %v2816_v3, %s2624_s19  ;;  %v2377_v6 = vld [vmem:[%s3789_s0 + $0x78] sm:$0xf0]  ;;  %s2626_s0 = smov 48  }
  0x1c   :  { %v2380_v9 = vor.u32 %v2539_v5, %v2377_v6 }
  0x1e   :  { %2591 = vmatpush.bf16.msra.mxu1 %v2541_v7  ;;  %258 = vmatpush.bf16.msra.mxu0 %v2541_v7 }
  0x1f   :  { %2592 = vmatpush.bf16.msra.mxu2 %v2541_v7 }
  0x20   :  { %1273 = vrot.lane.b32.xlu0 %v2816_v3, %s2625_s20 }
  0x21   :  { %284 = vmatmul.bf16.vlgmr.msra.gmra.mxu1 %v2360_v13  ;;  %259 = vmatmul.bf16.vlgmr.msra.gmra.mxu0 %v2320_v14  ;;  %v2840_v13 = vld [vmem:[%s3788_s2] ss:$0 sm:$0xff] }
  0x22   :  { %300 = vmatpush.bf16.msrb.mxu1 %v2556_v12  ;;  %294 = vmatmul.bf16.vlgmr.msra.gmra.mxu2 %v2376_v54 }
  0x23   :  { %759 = vrot.lane.b32.xlu2 %v1426_v61, %s2622_s13  ;;  %1275 = vrot.lane.b32.xlu1 %v1236_v8, %s2625_s20 }
  0x26   :  { %301 = vmatpush.bf16.msrb.mxu1 %v2555_v15 }
  0x28   :  { %856 = vrot.lane.b32.xlu0 %v1522_v60, %s2621_s12 }
  0x2a   :  { %302 = vmatpush.bf16.msrb.mxu1 %v2554_v16 }
  0x2e   :  { %303 = vmatpush.bf16.msrb.mxu1 %v2553_v17 }
  0x31   :  { %289 = vmatmul.bf16.gmra.mxu1 %v2368_v23  ;;  %264 = vmatmul.bf16.gmra.mxu0 %v2328_v24 }
  0x32   :  { %304 = vmatpush.bf16.msrb.mxu1 %v2552_v22 }
  0x36   :  { %305 = vmatpush.bf16.msrb.mxu1 %v2551_v25 }
  0x3a   :  { %306 = vmatpush.bf16.msrb.mxu1 %v2550_v26 }
  0x3e   :  { %307 = vmatpush.bf16.msrb.mxu1 %v2549_v27 }
  0x41   :  { %308 = vmatmul.bf16.vlgmr.msrb.gmra.mxu1 %v2324_v32  ;;  %269 = vmatmul.bf16.gmra.mxu0 %v2336_v33 }
  0x51   :  { %313 = vmatmul.bf16.gmra.mxu1 %v2332_v36  ;;  %274 = vmatmul.bf16.gmra.mxu0 %v2344_v39 }
  0x61   :  { %318 = vmatmul.bf16.gmra.mxu1 %v2340_v42  ;;  %279 = vmatmul.bf16.gmra.mxu0 %v2352_v45 }
  0x6b   :  { %v2886_v0 = vpop.permute.xlu2 %1559 }
  0x71   :  { %323 = vmatmul.bf16.gmra.mxu1 %v2348_v48 }
  0x81   :  { %328 = vmatmul.bf16.gmra.mxu1 %v2356_v51 }
  0x91   :  { %333 = vmatmul.bf16.gmra.mxu1 %v2364_v58 }
  0x9e   :  { %v2813_v2 = vpop.f32.mrf.mxu1  ;;  %v260_v7 = vpop.f32.mrf.mxu0 }
  0x9f   :  { %v261_v14 = vadd.f32 %v2840_v13, %v260_v7 }
  0xa1   :  { %338 = vmatmul.bf16.gmra.mxu1 %v2372_v1 }
  0xa6   :  { %v2822_v4 = vpop.f32.mrf.mxu1  ;;  %v262_v11 = vpop.f32.mrf.mxu0 }
  0xa7   :  { %v263_v19 = vadd.f32 %v2840_v13, %v262_v11 }
  0xae   :  { %v2833_v10 = vpop.f32.mrf.mxu1  ;;  %v265_v15 = vpop.f32.mrf.mxu0 }
  0xaf   :  { %v266_v25 = vadd.f32 %v2840_v13, %v265_v15 }
  0xb1   :  { %343 = vmatmul.bf16.gmra.mxu1 %v2380_v9  ;;  %v1178_v9 = vpop.permute.xlu2 %1177 }
  0xb2   :  { %1219 = vst.msk [vmem:[#allocation3 + $0x68] sm:$0xff] %vm502_vm1, %v1178_v9 }
  0xb6   :  { %v2835_v12 = vpop.f32.mrf.mxu1  ;;  %v267_v21 = vpop.f32.mrf.mxu0 }
  0xb7   :  { %v268_v33 = vadd.f32 %v2840_v13, %v267_v21 }
  0xbe   :  { %v309_v16 = vpop.f32.mrf.mxu1  ;;  %v270_v28 = vpop.f32.mrf.mxu0 }
  0xbf   :  { %v310_v17 = vadd.f32 %v309_v16, %v261_v14  ;;  %v271_v41 = vadd.f32 %v2840_v13, %v270_v28 }
  0xc1   :  { %v349_v18 = vmax.f32 %v310_v17, 0.0 }
  0xc3   :  { %366 = vst.msk [vmem:[#allocation2] sm:$0xff] %vm365_vm0, %v349_v18 }
  0xc6   :  { %v311_v20 = vpop.f32.mrf.mxu1  ;;  %v272_v36 = vpop.f32.mrf.mxu0 }
  0xc7   :  { %v312_v22 = vadd.f32 %v311_v20, %v263_v19  ;;  %v273_v48 = vadd.f32 %v2840_v13, %v272_v36  ;;  %v2903_v19 = vpop.permute.xlu0 %1751 }
  0xc9   :  { %v350_v23 = vmax.f32 %v312_v22, 0.0 }
  0xca   :  { %v390_v24 = vld [vmem:[#allocation2] sm:$0xff] }
  0xcb   :  { %367 = vst.msk [vmem:[#allocation2 + $0x8] sm:$0xff] %vm365_vm0, %v350_v23 }
  0xcc   :  { %406 = vst.msk [vmem:[#allocation3] sm:$0xff] %vm365_vm0, %v390_v24  ;;  %v2912_v24 = vld [vmem:[#allocation2 + $0x48] sm:$0xff] }
  0xcd   :  { %1124 = vst.msk [vmem:[#allocation3 + $0x78] sm:$0xff] %vm365_vm0, %v2912_v24 }
  0xce   :  { %v314_v26 = vpop.f32.mrf.mxu1  ;;  %v275_v47 = vpop.f32.mrf.mxu0 }
  0xcf   :  { %v315_v27 = vadd.f32 %v314_v26, %v266_v25  ;;  %v276_v54 = vadd.f32 %v2840_v13, %v275_v47  ;;  %v2914_v25 = vpop.permute.xlu1 %1463  ;;  %v286_v26 = vadd.f32 %v2840_v13, %v2813_v2  ;;  %v1180_v28 = vpop.permute.xlu0 %1179  ;;  %v288_v2 = vadd.f32 %v2840_v13, %v2822_v4 }
  0xd0   :  { %1220 = vst.msk [vmem:[#allocation3 + $0x78] sm:$0xff] %vm502_vm1, %v1180_v28  ;;  %v291_v4 = vadd.f32 %v2840_v13, %v2833_v10  ;;  %v293_v10 = vadd.f32 %v2840_v13, %v2835_v12 }
  0xd1   :  { %v351_v29 = vmax.f32 %v315_v27, 0.0 }
  0xd2   :  { %v713_v30 = vld [vmem:[#allocation2 + $0x8] sm:$0xff] }
  0xd3   :  { %v519_v31 = vld [vmem:[#allocation2 + $0x2] sm:$0xff]  ;;  %368 = vst.msk [vmem:[#allocation2 + $0x10] sm:$0xff] %vm365_vm0, %v351_v29  ;;  %745 = vrot.lane.b32.xlu2 %v713_v30, %s2622_s13 }
  0xd4   :  { %v422_v32 = vld [vmem:[#allocation2 + $0x1] sm:$0xff]  ;;  %551 = vrot.lane.b32.xlu1 %v519_v31, %s2625_s20  ;;  %407 = vst.msk [vmem:[#allocation3 + $0x10] sm:$0xff] %vm365_vm0, %v713_v30 }
  0xd5   :  { %454 = vrot.lane.b32.xlu0 %v422_v32, %s2623_s18  ;;  %v616_v39 = vld [vmem:[#allocation2 + $0x3] sm:$0xff] }
  0xd6   :  { %v316_v34 = vpop.f32.mrf.mxu1  ;;  %v277_v56 = vpop.f32.mrf.mxu0 }
  0xd7   :  { %v317_v35 = vadd.f32 %v316_v34, %v268_v33  ;;  %v278_v62 = vadd.f32 %v2840_v13, %v277_v56  ;;  %v2928_v32 = vpop.permute.xlu1 %1655  ;;  %v1274_v34 = vpop.permute.xlu0 %1273 }
  0xd8   :  { %1315 = vst.msk [vmem:[#allocation3 + $0x68] sm:$0xff] %vm599_vm2, %v1274_v34 }
  0xd9   :  { %v352_v37 = vmax.f32 %v317_v35, 0.0 }
  0xda   :  { %v520_v38 = vld [vmem:[#allocation2 + $0xa] sm:$0xff] }
  0xdb   :  { %v423_v40 = vld [vmem:[#allocation2 + $0x9] sm:$0xff]  ;;  %369 = vst.msk [vmem:[#allocation2 + $0x18] sm:$0xff] %vm365_vm0, %v352_v37  ;;  %553 = vrot.lane.b32.xlu2 %v520_v38, %s2625_s20 }
  0xdc   :  { %648 = vrot.lane.b32.xlu1 %v616_v39, %s2626_s0  ;;  %v714_v42 = vld [vmem:[#allocation2 + $0x10] sm:$0xff] }
  0xdd   :  { %456 = vrot.lane.b32.xlu0 %v423_v40, %s2623_s18  ;;  %408 = vst.msk [vmem:[#allocation3 + $0x20] sm:$0xff] %vm365_vm0, %v714_v42  ;;  %v617_v46 = vld [vmem:[#allocation2 + $0xb] sm:$0xff] }
  0xde   :  { %1117 = vst.msk [vmem:[#allocation3 + $0x8] sm:$0xff] %vm365_vm0, %v714_v42  ;;  %v319_v43 = vpop.f32.mrf.mxu1  ;;  %v280_v5 = vpop.f32.mrf.mxu0 }
  0xdf   :  { %v320_v44 = vadd.f32 %v319_v43, %v271_v41  ;;  %v281_v8 = vadd.f32 %v2840_v13, %v280_v5 }
  0xe1   :  { %v353_v45 = vmax.f32 %v320_v44, 0.0 }
  0xe2   :  { %v715_v49 = vld [vmem:[#allocation2 + $0x18] sm:$0xff] }
  0xe3   :  { %370 = vst.msk [vmem:[#allocation2 + $0x20] sm:$0xff] %vm365_vm0, %v353_v45  ;;  %650 = vrot.lane.b32.xlu2 %v617_v46, %s2626_s0  ;;  %v424_v53 = vld [vmem:[#allocation2 + $0x11] sm:$0xff] }
  0xe4   :  { %939 = vrot.lane.b32.xlu1 %v520_v38, %s2624_s19  ;;  %409 = vst.msk [vmem:[#allocation3 + $0x30] sm:$0xff] %vm365_vm0, %v715_v49  ;;  %v1325_v60 = vld [vmem:[#allocation2 + $0x13] sm:$0xff]  ;;  %v1276_v38 = vpop.permute.xlu1 %1275 }
  0xe5   :  { %747 = vrot.lane.b32.xlu0 %v714_v42, %s2622_s13  ;;  %1118 = vst.msk [vmem:[#allocation3 + $0x18] sm:$0xff] %vm365_vm0, %v715_v49  ;;  %v1229_v61 = vld [vmem:[#allocation2 + $0x12] sm:$0xff]  ;;  %v2949_v42 = vpop.permute.xlu2 %759 }
  0xe6   :  { %v321_v50 = vpop.f32.mrf.mxu1  ;;  %v282_v15 = vpop.f32.mrf.mxu0  ;;  %1316 = vst.msk [vmem:[#allocation3 + $0x78] sm:$0xff] %vm599_vm2, %v1276_v38 }
  0xe7   :  { %v322_v51 = vadd.f32 %v321_v50, %v273_v48  ;;  %v283_v17 = vadd.f32 %v2840_v13, %v282_v15 }
  0xe9   :  { %v354_v52 = vmax.f32 %v322_v51, 0.0 }
  0xea   :  { %v2872_v55 = vld [vmem:[#allocation2 + $0x20] sm:$0xff] }
  0xeb   :  { %1036 = vrot.lane.b32.xlu2 %v617_v46, %s2620_s11  ;;  %371 = vst.msk [vmem:[#allocation2 + $0x28] sm:$0xff] %vm365_vm0, %v354_v52  ;;  %v2905_v22 = vld [vmem:[#allocation2 + $0x1a] sm:$0xff]  ;;  %v295_v46 = vpop.f32.mrf.mxu2 }
  0xec   :  { %458 = vrot.lane.b32.xlu1 %v424_v53, %s2623_s18  ;;  %410 = vst.msk [vmem:[#allocation3 + $0x40] sm:$0xff] %vm365_vm0, %v2872_v55  ;;  %v425_v23 = vld [vmem:[#allocation2 + $0x19] sm:$0xff] }
  0xed   :  { %842 = vrot.lane.b32.xlu0 %v423_v40, %s2621_s12  ;;  %1119 = vst.msk [vmem:[#allocation3 + $0x28] sm:$0xff] %vm365_vm0, %v2872_v55  ;;  %v1709_v31 = vld [vmem:[#allocation2 + $0x1b] sm:$0xff] }
  0xee   :  { %v324_v57 = vpop.f32.mrf.mxu1 }
  0xef   :  { %v325_v58 = vadd.f32 %v324_v57, %v276_v54 }
  0xf1   :  { %v355_v59 = vmax.f32 %v325_v58, 0.0  ;;  %v2986_v58 = vpop.permute.xlu0 %856 }
  0xf2   :  { %v2883_v63 = vld [vmem:[#allocation2 + $0x28] sm:$0xff] }
  0xf3   :  { %1357 = vrot.lane.b32.xlu2 %v1325_v60, %s2626_s0  ;;  %372 = vst.msk [vmem:[#allocation2 + $0x30] sm:$0xff] %vm365_vm0, %v355_v59  ;;  %v426_v48 = vld [vmem:[#allocation2 + $0x21] sm:$0xff] }
  0xf4   :  { %1261 = vrot.lane.b32.xlu1 %v1229_v61, %s2625_s20  ;;  %411 = vst.msk [vmem:[#allocation3 + $0x50] sm:$0xff] %vm365_vm0, %v2883_v63  ;;  %v523_v54 = vld [vmem:[#allocation2 + $0x22] sm:$0xff] }
  0xf5   :  { %555 = vrot.lane.b32.xlu0 %v1229_v61, %s2625_s20  ;;  %1120 = vst.msk [vmem:[#allocation3 + $0x38] sm:$0xff] %vm365_vm0, %v2883_v63 }
  0xf6   :  { %v326_v1 = vpop.f32.mrf.mxu1 }
  0xf7   :  { %v327_v6 = vadd.f32 %v326_v1, %v278_v62 }
  0xf9   :  { %v356_v7 = vmax.f32 %v327_v6, 0.0  ;;  %v2564_v6 = vld [vmem:[%s3790_s3 + $0x38] sm:$0xff] }
  0xfa   :  { %1985 = vmatpush.bf16.msrb.mxu2 %v2564_v6  ;;  %v524_v15 = vld [vmem:[#allocation2 + $0x2a] sm:$0xff] }
  0xfb   :  { %941 = vrot.lane.b32.xlu2 %v1229_v61, %s2624_s19  ;;  %373 = vst.msk [vmem:[#allocation2 + $0x38] sm:$0xff] %vm365_vm0, %v356_v7  ;;  %v2563_v7 = vld [vmem:[%s3790_s3 + $0x30] sm:$0xff] }
  0xfc   :  { %844 = vrot.lane.b32.xlu1 %v424_v53, %s2621_s12 }
  0xfd   :  { %1165 = vrot.lane.b32.xlu0 %v424_v53, %s2623_s18 }
  0xfe   :  { %v329_v11 = vpop.f32.mrf.mxu1  ;;  %1986 = vmatpush.bf16.msrb.mxu2 %v2563_v7  ;;  %v2567_v7 = vld [vmem:[%s3790_s3 + $0x50] sm:$0xff] }
  0xff   :  { %v330_v14 = vadd.f32 %v329_v11, %v281_v8 }
 0x101   :  { %v357_v16 = vmax.f32 %v330_v14, 0.0  ;;  %v2562_v14 = vld [vmem:[%s3790_s3 + $0x28] sm:$0xff] }
 0x102   :  { %v2990_v61 = vld [vmem:[#allocation2 + $0x38] sm:$0xff]  ;;  %1987 = vmatpush.bf16.msrb.mxu2 %v2562_v14 }
 0x103   :  { %749 = vrot.lane.b32.xlu2 %v715_v49, %s2622_s13  ;;  %374 = vst.msk [vmem:[#allocation2 + $0x60] sm:$0xff] %vm365_vm0, %v357_v16  ;;  %v2561_v16 = vld [vmem:[%s3790_s3 + $0x20] sm:$0xff] }
 0x104   :  { %652 = vrot.lane.b32.xlu1 %v1325_v60, %s2626_s0  ;;  %413 = vst.msk [vmem:[#allocation3 + $0x70] sm:$0xff] %vm365_vm0, %v2990_v61 }
 0x105   :  { %1453 = vrot.lane.b32.xlu0 %v715_v49, %s2622_s13  ;;  %v296_v49 = vadd.f32 %v2840_v13, %v295_v46  ;;  %1122 = vst.msk [vmem:[#allocation3 + $0x58] sm:$0xff] %vm365_vm0, %v2990_v61 }
 0x106   :  { %v331_v18 = vpop.f32.mrf.mxu1  ;;  %1988 = vmatpush.bf16.msrb.mxu2 %v2561_v16  ;;  %v2565_v16 = vld [vmem:[%s3790_s3 + $0x40] sm:$0xff] }
 0x107   :  { %v332_v20 = vadd.f32 %v331_v18, %v283_v17 }
 0x109   :  { %v358_v21 = vmax.f32 %v332_v20, 0.0 }
 0x10b   :  { %1263 = vrot.lane.b32.xlu2 %v2905_v22, %s2625_s20  ;;  %375 = vst.msk [vmem:[#allocation2 + $0x68] sm:$0xff] %vm365_vm0, %v358_v21  ;;  %v427_v21 = vld [vmem:[#allocation2 + $0x29] sm:$0xff] }
 0x10c   :  { %460 = vrot.lane.b32.xlu1 %v425_v23, %s2623_s18 }
 0x10d   :  { %1038 = vrot.lane.b32.xlu0 %v1325_v60, %s2620_s11  ;;  %v2988_v60 = vld [vmem:[#allocation2 + $0x30] sm:$0xff] }
 0x10e   :  { %v334_v27 = vpop.f32.mrf.mxu1  ;;  %412 = vst.msk [vmem:[#allocation3 + $0x60] sm:$0xff] %vm365_vm0, %v2988_v60 }
 0x10f   :  { %v335_v29 = vadd.f32 %v334_v27, %v286_v26  ;;  %1121 = vst.msk [vmem:[#allocation3 + $0x48] sm:$0xff] %vm365_vm0, %v2988_v60 }
 0x111   :  { %v359_v30 = vmax.f32 %v335_v29, 0.0  ;;  %v2558_v29 = vld [vmem:[%s3790_s3 + $0x8] sm:$0xff] }
 0x113   :  { %376 = vst.msk [vmem:[#allocation2 + $0x70] sm:$0xff] %vm365_vm0, %v359_v30  ;;  %1741 = vrot.lane.b32.xlu2 %v1709_v31, %s2620_s11  ;;  %v2557_v30 = vld [vmem:[%s3790_s3] sm:$0xff] }
 0x114   :  { %557 = vrot.lane.b32.xlu1 %v2905_v22, %s2625_s20 }
 0x115   :  { %1359 = vrot.lane.b32.xlu0 %v1709_v31, %s2626_s0 }
 0x116   :  { %v336_v33 = vpop.f32.mrf.mxu1 }
 0x117   :  { %v337_v35 = vadd.f32 %v336_v33, %v288_v2 }
 0x119   :  { %v360_v36 = vmax.f32 %v337_v35, 0.0 }
 0x11a   :  { %v2934_v37 = vld [vmem:[#allocation2 + $0x70] sm:$0xff] }
 0x11b   :  { %377 = vst.msk [vmem:[#allocation2 + $0x78] sm:$0xff] %vm365_vm0, %v360_v36  ;;  %654 = vrot.lane.b32.xlu2 %v1709_v31, %s2626_s0 }
 0x11c   :  { %1167 = vrot.lane.b32.xlu1 %v425_v23, %s2623_s18  ;;  %416 = vst.msk [vmem:[#allocation3 + $0xa0] sm:$0xff] %vm365_vm0, %v2934_v37 }
 0x11d   :  { %1645 = vrot.lane.b32.xlu0 %v2905_v22, %s2624_s19  ;;  %1125 = vst.msk [vmem:[#allocation3 + $0x88] sm:$0xff] %vm365_vm0, %v2934_v37 }
 0x11e   :  { %v339_v39 = vpop.f32.mrf.mxu1 }
 0x11f   :  { %v340_v40 = vadd.f32 %v339_v39, %v291_v4 }
 0x121   :  { %v361_v41 = vmax.f32 %v340_v40, 0.0  ;;  %v2572_v40 = vld [vmem:[%s3790_s3 + $0x78] sm:$0xff] }
 0x122   :  { %v2951_v43 = vld [vmem:[#allocation2 + $0x78] sm:$0xff]  ;;  %2034 = vmatpush.bf16.msra.mxu3 %v2572_v40  ;;  %v1331_v40 = vld [vmem:[#allocation2 + $0x43] sm:$0xff] }
 0x123   :  { %378 = vst.msk [vmem:[#allocation2 + $0x80] sm:$0xff] %vm365_vm0, %v361_v41  ;;  %1040 = vrot.lane.b32.xlu2 %v1709_v31, %s2620_s11  ;;  %v3077_v41 = vld [vmem:[#allocation2 + $0x39] sm:$0xff] }
 0x124   :  { %1455 = vrot.lane.b32.xlu1 %v2872_v55, %s2622_s13  ;;  %417 = vst.msk [vmem:[#allocation3 + $0xb0] sm:$0xff] %vm365_vm0, %v2951_v43 }
 0x125   :  { %751 = vrot.lane.b32.xlu0 %v2872_v55, %s2622_s13  ;;  %1126 = vst.msk [vmem:[#allocation3 + $0x98] sm:$0xff] %vm365_vm0, %v2951_v43  ;;  %v1710_v55 = vld [vmem:[#allocation2 + $0x23] sm:$0xff] }
 0x126   :  { %v341_v44 = vpop.f32.mrf.mxu1 }
 0x127   :  { %v342_v45 = vadd.f32 %v341_v44, %v293_v10  ;;  %v428_v10 = vld [vmem:[#allocation2 + $0x31] sm:$0xff] }
 0x129   :  { %v362_v47 = vmax.f32 %v342_v45, 0.0 }
 0x12a   :  { %v2965_v50 = vld [vmem:[#allocation2 + $0x80] sm:$0xff] }
 0x12b   :  { %379 = vst.msk [vmem:[#allocation2 + $0x88] sm:$0xff] %vm365_vm0, %v362_v47  ;;  %462 = vrot.lane.b32.xlu2 %v426_v48, %s2623_s18  ;;  %v2571_v47 = vld [vmem:[%s3790_s3 + $0x70] sm:$0xff] }
 0x12c   :  { %1549 = vrot.lane.b32.xlu1 %v425_v23, %s2621_s12  ;;  %418 = vst.msk [vmem:[#allocation3 + $0xc0] sm:$0xff] %vm365_vm0, %v2965_v50  ;;  %2035 = vmatpush.bf16.msra.mxu3 %v2571_v47 }
 0x12d   :  { %846 = vrot.lane.b32.xlu0 %v425_v23, %s2621_s12  ;;  %v746_v12 = vpop.permute.xlu2 %745  ;;  %1127 = vst.msk [vmem:[#allocation3 + $0xa8] sm:$0xff] %vm365_vm0, %v2965_v50  ;;  %v2559_v23 = vld [vmem:[%s3790_s3 + $0x10] sm:$0xff] }
 0x12e   :  { %v344_v51 = vpop.f32.mrf.mxu1 }
 0x12f   :  { %v345_v52 = vadd.f32 %v344_v51, %v296_v49  ;;  %v3093_v49 = vld [vmem:[#allocation2 + $0x32] sm:$0xff] }
 0x131   :  { %v363_v53 = vmax.f32 %v345_v52, 0.0 }
 0x132   :  { %v2976_v56 = vld [vmem:[#allocation2 + $0x88] sm:$0xff] }
 0x133   :  { %380 = vst.msk [vmem:[#allocation2 + $0x90] sm:$0xff] %vm365_vm0, %v363_v53  ;;  %559 = vrot.lane.b32.xlu2 %v523_v54, %s2625_s20 }
 0x134   :  { %943 = vrot.lane.b32.xlu1 %v2905_v22, %s2624_s19  ;;  %419 = vst.msk [vmem:[#allocation3 + $0xd0] sm:$0xff] %vm365_vm0, %v2976_v56  ;;  %v1328_v22 = vld [vmem:[#allocation2 + $0x2b] sm:$0xff] }
 0x135   :  { %1743 = vrot.lane.b32.xlu0 %v1710_v55, %s2620_s11  ;;  %v554_v57 = vpop.permute.xlu2 %553  ;;  %1128 = vst.msk [vmem:[#allocation3 + $0xb8] sm:$0xff] %vm365_vm0, %v2976_v56 }
 0x13b   :  { %1551 = vrot.lane.b32.xlu2 %v426_v48, %s2621_s12 }
 0x13c   :  { %1647 = vrot.lane.b32.xlu1 %v523_v54, %s2624_s19 }
 0x13d   :  { %1169 = vrot.lane.b32.xlu0 %v426_v48, %s2623_s18  ;;  %v651_v59 = vpop.permute.xlu2 %650 }
 0x143   :  { %1361 = vrot.lane.b32.xlu2 %v1710_v55, %s2626_s0 }
 0x144   :  { %1265 = vrot.lane.b32.xlu1 %v523_v54, %s2625_s20 }
 0x145   :  { %1457 = vrot.lane.b32.xlu0 %v2883_v63, %s2622_s13  ;;  %v1037_v62 = vpop.permute.xlu2 %1036 }
 0x146   :  { %v552_v1 = vpop.permute.xlu1 %551 }
 0x147   :  { %v455_v5 = vpop.permute.xlu0 %454 }
 0x148   :  { %503 = vst.msk [vmem:[#allocation3] sm:$0xff] %vm502_vm1, %v455_v5 }
 0x149   :  { %600 = vst.msk [vmem:[#allocation3] sm:$0xff] %vm599_vm2, %v552_v1 }
 0x14b   :  { %945 = vrot.lane.b32.xlu2 %v523_v54, %s2624_s19 }
 0x14c   :  { %848 = vrot.lane.b32.xlu1 %v426_v48, %s2621_s12  ;;  %v2570_v48 = vld [vmem:[%s3790_s3 + $0x68] sm:$0xff] }
 0x14d   :  { %1042 = vrot.lane.b32.xlu0 %v1710_v55, %s2620_s11  ;;  %v1358_v8 = vpop.permute.xlu2 %1357  ;;  %2036 = vmatpush.bf16.msra.mxu3 %v2570_v48 }
 0x14e   :  { %v649_v9 = vpop.permute.xlu1 %648 }
 0x14f   :  { %697 = vst.msk [vmem:[#allocation3] sm:$0xff] %vm696_vm3, %v649_v9  ;;  %v457_v11 = vpop.permute.xlu0 %456  ;;  %v3133_v9 = vld [vmem:[#allocation2 + $0x3b] sm:$0xff] }
 0x150   :  { %504 = vst.msk [vmem:[#allocation3 + $0x10] sm:$0xff] %vm502_vm1, %v457_v11 }
 0x151   :  { %601 = vst.msk [vmem:[#allocation3 + $0x10] sm:$0xff] %vm599_vm2, %v554_v57 }
 0x152   :  { %698 = vst.msk [vmem:[#allocation3 + $0x10] sm:$0xff] %vm696_vm3, %v651_v59  ;;  %v2569_v59 = vld [vmem:[%s3790_s3 + $0x60] sm:$0xff] }
 0x153   :  { %794 = vst.msk [vmem:[#allocation3] sm:$0xff] %vm793_vm4, %v746_v12  ;;  %753 = vrot.lane.b32.xlu2 %v2883_v63, %s2622_s13  ;;  %v2560_v63 = vld [vmem:[%s3790_s3 + $0x18] sm:$0xff]  ;;  %2037 = vmatpush.bf16.msra.mxu3 %v2569_v59 }
 0x154   :  { %656 = vrot.lane.b32.xlu1 %v1710_v55, %s2626_s0  ;;  %1989 = vmatpush.bf16.msrb.mxu2 %v2560_v63  ;;  %v3098_v12 = vld [vmem:[#allocation2 + $0x33] sm:$0xff] }
 0x155   :  { %561 = vrot.lane.b32.xlu0 %v524_v15, %s2625_s20  ;;  %v942_v17 = vpop.permute.xlu2 %941 }
 0x156   :  { %v940_v18 = vpop.permute.xlu1 %939 }
 0x157   :  { %v748_v20 = vpop.permute.xlu0 %747 }
 0x158   :  { %795 = vst.msk [vmem:[#allocation3 + $0x10] sm:$0xff] %vm793_vm4, %v748_v20  ;;  %1990 = vmatpush.bf16.msrb.mxu2 %v2559_v23  ;;  %v3160_v23 = vld [vmem:[#allocation2 + $0x68] sm:$0xff] }
 0x159   :  { %415 = vst.msk [vmem:[#allocation3 + $0x90] sm:$0xff] %vm365_vm0, %v3160_v23 }
 0x15b   :  { %464 = vrot.lane.b32.xlu2 %v427_v21, %s2623_s18 }
 0x15c   :  { %1171 = vrot.lane.b32.xlu1 %v427_v21, %s2623_s18  ;;  %1991 = vmatpush.bf16.msrb.mxu2 %v2558_v29 }
 0x15d   :  { %1363 = vrot.lane.b32.xlu0 %v1328_v22, %s2626_s0  ;;  %v750_v26 = vpop.permute.xlu2 %749 }
 0x15e   :  { %v459_v27 = vpop.permute.xlu1 %458 }
 0x15f   :  { %505 = vst.msk [vmem:[#allocation3 + $0x20] sm:$0xff] %vm502_vm1, %v459_v27  ;;  %v843_v28 = vpop.permute.xlu0 %842 }
 0x160   :  { %891 = vst.msk [vmem:[#allocation3] sm:$0xff] %vm890_vm5, %v843_v28  ;;  %1992 = vmatpush.bf16.msrb.mxu2 %v2557_v30  ;;  %v3176_v30 = vld [vmem:[#allocation2 + $0x4b] sm:$0xff] }
 0x161   :  { %988 = vst.msk [vmem:[#allocation3] sm:$0xff] %vm987_vm6, %v940_v18 }
 0x162   :  { %1085 = vst.msk [vmem:[#allocation3] sm:$0xff] %vm1084_vm7, %v1037_v62  ;;  %v3111_v62 = vld [vmem:[#allocation2 + $0x3a] sm:$0xff] }
 0x163   :  { %1267 = vrot.lane.b32.xlu2 %v524_v15, %s2625_s20 }
 0x164   :  { %1459 = vrot.lane.b32.xlu1 %v2988_v60, %s2622_s13 }
 0x165   :  { %1649 = vrot.lane.b32.xlu0 %v524_v15, %s2624_s19  ;;  %v3054_v31 = vpop.permute.xlu2 %1263 }
 0x166   :  { %v1262_v2 = vpop.permute.xlu1 %1261 }
 0x167   :  { %v556_v33 = vpop.permute.xlu0 %555 }
 0x168   :  { %602 = vst.msk [vmem:[#allocation3 + $0x20] sm:$0xff] %vm599_vm2, %v556_v33 }
 0x169   :  { %v1805_v54 = vld [vmem:[#allocation3] sm:$0xff] }
 0x16b   :  { %1745 = vrot.lane.b32.xlu2 %v1328_v22, %s2620_s11 }
 0x16c   :  { %1553 = vrot.lane.b32.xlu1 %v427_v21, %s2621_s12 }
 0x16d   :  { %755 = vrot.lane.b32.xlu0 %v2988_v60, %s2622_s13  ;;  %v3061_v34 = vpop.permute.xlu2 %1741  ;;  %v2568_v60 = vld [vmem:[%s3790_s3 + $0x58] sm:$0xff] }
 0x16e   :  { %v845_v35 = vpop.permute.xlu1 %844  ;;  %2038 = vmatpush.bf16.msra.mxu3 %v2568_v60 }
 0x16f   :  { %892 = vst.msk [vmem:[#allocation3 + $0x10] sm:$0xff] %vm890_vm5, %v845_v35  ;;  %v1166_v36 = vpop.permute.xlu0 %1165 }
 0x170   :  { %989 = vst.msk [vmem:[#allocation3 + $0x10] sm:$0xff] %vm987_vm6, %v942_v17 }
 0x171   :  { %1213 = vst.msk [vmem:[#allocation3 + $0x8] sm:$0xff] %vm502_vm1, %v1166_v36 }
 0x172   :  { %1309 = vst.msk [vmem:[#allocation3 + $0x8] sm:$0xff] %vm599_vm2, %v1262_v2  ;;  %2039 = vmatpush.bf16.msra.mxu3 %v2567_v7  ;;  %v3230_v7 = vld [vmem:[#allocation2 + $0x71] sm:$0xff] }
 0x173   :  { %1405 = vst.msk [vmem:[#allocation3 + $0x8] sm:$0xff] %vm696_vm3, %v1358_v8  ;;  %658 = vrot.lane.b32.xlu2 %v1328_v22, %s2626_s0  ;;  %v2566_v8 = vld [vmem:[%s3790_s3 + $0x48] sm:$0xff] }
 0x174   :  { %947 = vrot.lane.b32.xlu1 %v524_v15, %s2624_s19 }
 0x175   :  { %850 = vrot.lane.b32.xlu0 %v427_v21, %s2621_s12  ;;  %v655_v4 = vpop.permute.xlu2 %654 }
 0x176   :  { %v653_v38 = vpop.permute.xlu1 %652  ;;  %2040 = vmatpush.bf16.msra.mxu3 %v2566_v8 }
 0x177   :  { %699 = vst.msk [vmem:[#allocation3 + $0x20] sm:$0xff] %vm696_vm3, %v653_v38  ;;  %v1454_v39 = vpop.permute.xlu0 %1453 }
 0x178   :  { %796 = vst.msk [vmem:[#allocation3 + $0x20] sm:$0xff] %vm793_vm4, %v750_v26  ;;  %v398_v26 = vld [vmem:[#allocation2 + $0x60] sm:$0xff] }
 0x179   :  { %1501 = vst.msk [vmem:[#allocation3 + $0x8] sm:$0xff] %vm793_vm4, %v1454_v39 }
 0x17a   :  { %2041 = vmatpush.bf16.msra.mxu3 %v2565_v16  ;;  %414 = vst.msk [vmem:[#allocation3 + $0x80] sm:$0xff] %vm365_vm0, %v398_v26  ;;  %v3250_v16 = vld [vmem:[#allocation2 + $0x81] sm:$0xff] }
 0x17b   :  { %1044 = vrot.lane.b32.xlu2 %v1328_v22, %s2620_s11 }
 0x17c   :  { %468 = vrot.lane.b32.xlu1 %v3077_v41, %s2623_s18 }
 0x17d   :  { %466 = vrot.lane.b32.xlu0 %v428_v10, %s2623_s18  ;;  %v3083_v44 = vpop.permute.xlu2 %1040 }
 0x17e   :  { %v461_v45 = vpop.permute.xlu1 %460 }
 0x17f   :  { %506 = vst.msk [vmem:[#allocation3 + $0x30] sm:$0xff] %vm502_vm1, %v461_v45  ;;  %v1039_v46 = vpop.permute.xlu0 %1038 }
 0x180   :  { %1086 = vst.msk [vmem:[#allocation3 + $0x10] sm:$0xff] %vm1084_vm7, %v1039_v46 }
 0x183   :  { %1555 = vrot.lane.b32.xlu2 %v428_v10, %s2621_s12 }
 0x184   :  { %1651 = vrot.lane.b32.xlu1 %v3093_v49, %s2624_s19 }
 0x185   :  { %1747 = vrot.lane.b32.xlu0 %v3098_v12, %s2620_s11  ;;  %v463_v51 = vpop.permute.xlu2 %462 }
 0x186   :  { %v558_v52 = vpop.permute.xlu1 %557  ;;  %507 = vst.msk [vmem:[#allocation3 + $0x40] sm:$0xff] %vm502_vm1, %v463_v51 }
 0x187   :  { %v1360_v53 = vpop.permute.xlu0 %1359  ;;  %v1807_v55 = vld [vmem:[#allocation3 + $0x10] sm:$0xff]  ;;  %603 = vst.msk [vmem:[#allocation3 + $0x30] sm:$0xff] %vm599_vm2, %v558_v52 }
 0x188   :  { %v1837_v57 = vpack.c.bf16 %v1807_v55, %v1805_v54  ;;  %700 = vst.msk [vmem:[#allocation3 + $0x30] sm:$0xff] %vm696_vm3, %v655_v4  ;;  %v3208_v52 = vld [vmem:[#allocation2 + $0x69] sm:$0xff] }
 0x18a   :  { %1993 = vmatmul.bf16.vlgmr.msrb.gmra.mxu2 %v1837_v57  ;;  %v1523_v57 = vld [vmem:[#allocation2 + $0x49] sm:$0xff] }
 0x18b   :  { %1271 = vrot.lane.b32.xlu2 %v3111_v62, %s2625_s20 }
 0x18c   :  { %1175 = vrot.lane.b32.xlu1 %v3077_v41, %s2623_s18 }
 0x18d   :  { %1173 = vrot.lane.b32.xlu0 %v428_v10, %s2623_s18  ;;  %v560_v1 = vpop.permute.xlu2 %559 }
 0x18e   :  { %v1168_v5 = vpop.permute.xlu1 %1167  ;;  %604 = vst.msk [vmem:[#allocation3 + $0x40] sm:$0xff] %vm599_vm2, %v560_v1  ;;  %v1619_v1 = vld [vmem:[#allocation2 + $0x4a] sm:$0xff] }
 0x18f   :  { %v1646_v6 = vpop.permute.xlu0 %1645  ;;  %1214 = vst.msk [vmem:[#allocation3 + $0x18] sm:$0xff] %vm502_vm1, %v1168_v5  ;;  %v1620_v5 = vld [vmem:[#allocation2 + $0x52] sm:$0xff] }
 0x190   :  { %1310 = vst.msk [vmem:[#allocation3 + $0x18] sm:$0xff] %vm599_vm2, %v3054_v31 }
 0x191   :  { %1406 = vst.msk [vmem:[#allocation3 + $0x18] sm:$0xff] %vm696_vm3, %v1360_v53 }
 0x193   :  { %1365 = vrot.lane.b32.xlu2 %v3098_v12, %s2626_s0 }
 0x194   :  { %1269 = vrot.lane.b32.xlu1 %v3093_v49, %s2625_s20 }
 0x195   :  { %1367 = vrot.lane.b32.xlu0 %v3133_v9, %s2626_s0  ;;  %v1552_v11 = vpop.permute.xlu2 %1551 }
 0x196   :  { %v1456_v14 = vpop.permute.xlu1 %1455 }
 0x197   :  { %1502 = vst.msk [vmem:[#allocation3 + $0x18] sm:$0xff] %vm793_vm4, %v1456_v14  ;;  %v752_v15 = vpop.permute.xlu0 %751  ;;  %v1524_v14 = vld [vmem:[#allocation2 + $0x51] sm:$0xff] }
 0x198   :  { %1598 = vst.msk [vmem:[#allocation3 + $0x18] sm:$0xff] %vm890_vm5, %v1552_v11 }
 0x199   :  { %797 = vst.msk [vmem:[#allocation3 + $0x30] sm:$0xff] %vm793_vm4, %v752_v15  ;;  %v3245_v15 = vld [vmem:[#allocation2 + $0x79] sm:$0xff] }
 0x19b   :  { %949 = vrot.lane.b32.xlu2 %v3093_v49, %s2624_s19 }
 0x19c   :  { %852 = vrot.lane.b32.xlu1 %v428_v10, %s2621_s12  ;;  %v1428_v10 = vld [vmem:[#allocation2 + $0x50] sm:$0xff] }
 0x19d   :  { %1461 = vrot.lane.b32.xlu0 %v2990_v61, %s2622_s13  ;;  %v1362_v17 = vpop.permute.xlu2 %1361 }
 0x19e   :  { %v1550_v18 = vpop.permute.xlu1 %1549 }
 0x19f   :  { %1597 = vst.msk [vmem:[#allocation3 + $0x8] sm:$0xff] %vm890_vm5, %v1550_v18  ;;  %v847_v20 = vpop.permute.xlu0 %846 }
 0x1a0   :  { %1693 = vst.msk [vmem:[#allocation3 + $0x8] sm:$0xff] %vm987_vm6, %v1646_v6 }
 0x1a1   :  { %1789 = vst.msk [vmem:[#allocation3 + $0x8] sm:$0xff] %vm1084_vm7, %v3061_v34 }
 0x1a2   :  { %893 = vst.msk [vmem:[#allocation3 + $0x20] sm:$0xff] %vm890_vm5, %v847_v20 }
 0x1a3   :  { %1749 = vrot.lane.b32.xlu2 %v3133_v9, %s2620_s11 }
 0x1a4   :  { %1557 = vrot.lane.b32.xlu1 %v3077_v41, %s2621_s12 }
 0x1a5   :  { %1046 = vrot.lane.b32.xlu0 %v3098_v12, %s2620_s11  ;;  %v946_v63 = vpop.permute.xlu2 %945 }
 0x1a6   :  { %v944_v21 = vpop.permute.xlu1 %943 }
 0x1a7   :  { %990 = vst.msk [vmem:[#allocation3 + $0x20] sm:$0xff] %vm987_vm6, %v944_v21  ;;  %v1744_v22 = vpop.permute.xlu0 %1743  ;;  %v527_v21 = vld [vmem:[#allocation2 + $0x62] sm:$0xff] }
 0x1a8   :  { %1087 = vst.msk [vmem:[#allocation3 + $0x20] sm:$0xff] %vm1084_vm7, %v3083_v44  ;;  %v1806_v34 = vld [vmem:[#allocation3 + $0x8] sm:$0xff] }
 0x1ab   :  { %565 = vrot.lane.b32.xlu2 %v3111_v62, %s2625_s20 }
 0x1ac   :  { %563 = vrot.lane.b32.xlu1 %v3093_v49, %s2625_s20 }
 0x1ad   :  { %1653 = vrot.lane.b32.xlu0 %v3111_v62, %s2624_s19  ;;  %v754_v27 = vpop.permute.xlu2 %753 }
 0x1ae   :  { %v1648_v28 = vpop.permute.xlu1 %1647 }
 0x1af   :  { %1694 = vst.msk [vmem:[#allocation3 + $0x18] sm:$0xff] %vm987_vm6, %v1648_v28  ;;  %v1170_v29 = vpop.permute.xlu0 %1169  ;;  %v1809_v47 = vld [vmem:[#allocation3 + $0x20] sm:$0xff] }
 0x1b0   :  { %1790 = vst.msk [vmem:[#allocation3 + $0x18] sm:$0xff] %vm1084_vm7, %v1744_v22 }
 0x1b1   :  { %1215 = vst.msk [vmem:[#allocation3 + $0x28] sm:$0xff] %vm502_vm1, %v1170_v29  ;;  %v624_v29 = vld [vmem:[#allocation2 + $0x63] sm:$0xff] }
 0x1b3   :  { %1371 = vrot.lane.b32.xlu2 %v3176_v30, %s2626_s0 }
 0x1b4   :  { %662 = vrot.lane.b32.xlu1 %v3133_v9, %s2626_s0 }
 0x1b5   :  { %660 = vrot.lane.b32.xlu0 %v3098_v12, %s2626_s0  ;;  %v465_v31 = vpop.permute.xlu2 %464  ;;  %v430_v12 = vld [vmem:[#allocation2 + $0x61] sm:$0xff] }
 0x1b6   :  { %v1266_v2 = vpop.permute.xlu1 %1265  ;;  %508 = vst.msk [vmem:[#allocation3 + $0x50] sm:$0xff] %vm502_vm1, %v465_v31  ;;  %v3265_v31 = vld [vmem:[#allocation2 + $0x89] sm:$0xff] }
 0x1b7   :  { %v1458_v33 = vpop.permute.xlu0 %1457  ;;  %v1808_v35 = vld [vmem:[#allocation3 + $0x18] sm:$0xff]  ;;  %1311 = vst.msk [vmem:[#allocation3 + $0x28] sm:$0xff] %vm599_vm2, %v1266_v2 }
 0x1b8   :  { %v1838_v36 = vpack.c.bf16 %v1808_v35, %v1806_v34  ;;  %1407 = vst.msk [vmem:[#allocation3 + $0x28] sm:$0xff] %vm696_vm3, %v1362_v17  ;;  %v528_v35 = vld [vmem:[#allocation2 + $0x6a] sm:$0xff] }
 0x1b9   :  { %1503 = vst.msk [vmem:[#allocation3 + $0x28] sm:$0xff] %vm793_vm4, %v1458_v33 }
 0x1ba   :  { %2042 = vmatmul.bf16.vlgmr.msra.gmra.mxu3 %v1838_v36  ;;  %v625_v36 = vld [vmem:[#allocation2 + $0x6b] sm:$0xff] }
 0x1bb   :  { %854 = vrot.lane.b32.xlu2 %v3077_v41, %s2621_s12 }
 0x1bc   :  { %757 = vrot.lane.b32.xlu1 %v2990_v61, %s2622_s13  ;;  %v297_v61 = vpop.f32.mrf.mxu2 }
 0x1bd   :  { %951 = vrot.lane.b32.xlu0 %v3111_v62, %s2624_s19  ;;  %v1268_v4 = vpop.permute.xlu2 %1267  ;;  %v298_v46 = vadd.f32 %v2840_v13, %v297_v61  ;;  %v3222_v62 = vld [vmem:[#allocation2 + $0x90] sm:$0xff] }
 0x1be   :  { %v849_v38 = vpop.permute.xlu1 %848  ;;  %420 = vst.msk [vmem:[#allocation3 + $0xe0] sm:$0xff] %vm365_vm0, %v3222_v62 }
 0x1bf   :  { %894 = vst.msk [vmem:[#allocation3 + $0x30] sm:$0xff] %vm890_vm5, %v849_v38  ;;  %v1043_v39 = vpop.permute.xlu0 %1042 }
 0x1c0   :  { %991 = vst.msk [vmem:[#allocation3 + $0x30] sm:$0xff] %vm987_vm6, %v946_v63  ;;  %v1716_v63 = vld [vmem:[#allocation2 + $0x53] sm:$0xff] }
 0x1c1   :  { %1088 = vst.msk [vmem:[#allocation3 + $0x30] sm:$0xff] %vm1084_vm7, %v1043_v39 }
 0x1c2   :  { %1129 = vst.msk [vmem:[#allocation3 + $0xc8] sm:$0xff] %vm365_vm0, %v3222_v62 }
 0x1c3   :  { %1465 = vrot.lane.b32.xlu2 %v2912_v24, %s2622_s13  ;;  %v346_v24 = vpop.f32.mrf.mxu1 }
 0x1c4   :  { %1369 = vrot.lane.b32.xlu1 %v1331_v40, %s2626_s0  ;;  %v347_v51 = vadd.f32 %v346_v24, %v298_v46  ;;  %v3295_v46 = vld [vmem:[#allocation2 + $0x72] sm:$0xff] }
 0x1c5   :  { %1467 = vrot.lane.b32.xlu0 %v1428_v10, %s2622_s13  ;;  %v1746_v41 = vpop.permute.xlu2 %1745 }
 0x1c6   :  { %v657_v44 = vpop.permute.xlu1 %656  ;;  %v364_v55 = vmax.f32 %v347_v51, 0.0 }
 0x1c7   :  { %701 = vst.msk [vmem:[#allocation3 + $0x40] sm:$0xff] %vm696_vm3, %v657_v44  ;;  %v562_v45 = vpop.permute.xlu0 %561 }
 0x1c8   :  { %798 = vst.msk [vmem:[#allocation3 + $0x40] sm:$0xff] %vm793_vm4, %v754_v27  ;;  %v1811_v48 = vld [vmem:[#allocation3 + $0x30] sm:$0xff] }
 0x1c9   :  { %605 = vst.msk [vmem:[#allocation3 + $0x50] sm:$0xff] %vm599_vm2, %v562_v45  ;;  %v1839_v49 = vpack.c.bf16 %v1811_v48, %v1809_v47 }
 0x1ca   :  { %381 = vst.msk [vmem:[#allocation2 + $0x98] sm:$0xff] %vm365_vm0, %v364_v55 }
 0x1cb   :  { %1998 = vmatmul.bf16.gmra.mxu2 %v1839_v49  ;;  %470 = vrot.lane.b32.xlu2 %v430_v12, %s2623_s18  ;;  %v3325_v49 = vld [vmem:[#allocation2 + $0x7b] sm:$0xff] }
 0x1cc   :  { %953 = vrot.lane.b32.xlu1 %v2816_v3, %s2624_s19 }
 0x1cd   :  { %472 = vrot.lane.b32.xlu0 %v3208_v52, %s2623_s18  ;;  %v659_v13 = vpop.permute.xlu2 %658 }
 0x1ce   :  { %v1172_v53 = vpop.permute.xlu1 %1171  ;;  %702 = vst.msk [vmem:[#allocation3 + $0x50] sm:$0xff] %vm696_vm3, %v659_v13 }
 0x1cf   :  { %v1364_v54 = vpop.permute.xlu0 %1363  ;;  %1216 = vst.msk [vmem:[#allocation3 + $0x38] sm:$0xff] %vm502_vm1, %v1172_v53 }
 0x1d0   :  { %1312 = vst.msk [vmem:[#allocation3 + $0x38] sm:$0xff] %vm599_vm2, %v1268_v4 }
 0x1d1   :  { %1408 = vst.msk [vmem:[#allocation3 + $0x38] sm:$0xff] %vm696_vm3, %v1364_v54  ;;  %v3228_v6 = vld [vmem:[#allocation2 + $0x98] sm:$0xff] }
 0x1d2   :  { %421 = vst.msk [vmem:[#allocation3 + $0xf0] sm:$0xff] %vm365_vm0, %v3228_v6  ;;  %v3263_v28 = vld [vmem:[#allocation2 + $0x99] sm:$0xff]  ;;  %v3274_v34 = vld [vmem:[#allocation2 + $0x91] sm:$0xff] }
 0x1d3   :  { %1050 = vrot.lane.b32.xlu2 %v1331_v40, %s2620_s11  ;;  %1130 = vst.msk [vmem:[#allocation3 + $0xd8] sm:$0xff] %vm365_vm0, %v3228_v6 }
 0x1d4   :  { %1048 = vrot.lane.b32.xlu1 %v3133_v9, %s2620_s11 }
 0x1d5   :  { %1561 = vrot.lane.b32.xlu0 %v1523_v57, %s2621_s12  ;;  %v1045_v3 = vpop.permute.xlu2 %1044 }
 0x1d6   :  { %v1460_v59 = vpop.permute.xlu1 %1459 }
 0x1d7   :  { %1504 = vst.msk [vmem:[#allocation3 + $0x38] sm:$0xff] %vm793_vm4, %v1460_v59  ;;  %v1650_v60 = vpop.permute.xlu0 %1649 }
 0x1db   :  { %1657 = vrot.lane.b32.xlu2 %v1619_v1, %s2624_s19 }
 0x1dc   :  { %474 = vrot.lane.b32.xlu1 %v3230_v7, %s2623_s18 }
 0x1dd   :  { %1659 = vrot.lane.b32.xlu0 %v1620_v5, %s2624_s19  ;;  %v1556_v8 = vpop.permute.xlu2 %1555 }
 0x1de   :  { %v1554_v9 = vpop.permute.xlu1 %1553  ;;  %1600 = vst.msk [vmem:[#allocation3 + $0x38] sm:$0xff] %vm890_vm5, %v1556_v8 }
 0x1df   :  { %v756_v11 = vpop.permute.xlu0 %755  ;;  %1599 = vst.msk [vmem:[#allocation3 + $0x28] sm:$0xff] %vm890_vm5, %v1554_v9 }
 0x1e0   :  { %1695 = vst.msk [vmem:[#allocation3 + $0x28] sm:$0xff] %vm987_vm6, %v1650_v60 }
 0x1e1   :  { %1791 = vst.msk [vmem:[#allocation3 + $0x28] sm:$0xff] %vm1084_vm7, %v1746_v41 }
 0x1e2   :  { %799 = vst.msk [vmem:[#allocation3 + $0x50] sm:$0xff] %vm793_vm4, %v756_v11 }
 0x1e3   :  { %476 = vrot.lane.b32.xlu2 %v3245_v15, %s2623_s18 }
 0x1e4   :  { %1563 = vrot.lane.b32.xlu1 %v1524_v14, %s2621_s12  ;;  %v3368_v14 = vld [vmem:[%s3791_s4] ss:$0 sm:$0xff] }
 0x1e5   :  { %478 = vrot.lane.b32.xlu0 %v3250_v16, %s2623_s18  ;;  %v1272_v17 = vpop.permute.xlu2 %1271 }
 0x1e6   :  { %v948_v18 = vpop.permute.xlu1 %947 }
 0x1e7   :  { %v851_v20 = vpop.permute.xlu0 %850 }
 0x1e8   :  { %895 = vst.msk [vmem:[#allocation3 + $0x40] sm:$0xff] %vm890_vm5, %v851_v20  ;;  %v1810_v40 = vld [vmem:[#allocation3 + $0x28] sm:$0xff] }
 0x1e9   :  { %992 = vst.msk [vmem:[#allocation3 + $0x40] sm:$0xff] %vm987_vm6, %v948_v18 }
 0x1ea   :  { %1089 = vst.msk [vmem:[#allocation3 + $0x40] sm:$0xff] %vm1084_vm7, %v1045_v3 }
 0x1eb   :  { %1755 = vrot.lane.b32.xlu2 %v1716_v63, %s2620_s11 }
 0x1ec   :  { %1753 = vrot.lane.b32.xlu1 %v3176_v30, %s2620_s11 }
 0x1ed   :  { %567 = vrot.lane.b32.xlu0 %v527_v21, %s2625_s20  ;;  %v1366_v22 = vpop.permute.xlu2 %1365 }
 0x1ee   :  { %v469_v26 = vpop.permute.xlu1 %468 }
 0x1ef   :  { %510 = vst.msk [vmem:[#allocation3 + $0x70] sm:$0xff] %vm502_vm1, %v469_v26  ;;  %v467_v27 = vpop.permute.xlu0 %466 }
 0x1f0   :  { %509 = vst.msk [vmem:[#allocation3 + $0x60] sm:$0xff] %vm502_vm1, %v467_v27 }
 0x1f3   :  { %664 = vrot.lane.b32.xlu2 %v624_v29, %s2626_s0 }
 0x1f4   :  { %480 = vrot.lane.b32.xlu1 %v3265_v31, %s2623_s18 }
 0x1f5   :  { %484 = vrot.lane.b32.xlu0 %v3263_v28, %s2623_s18  ;;  %v950_v30 = vpop.permute.xlu2 %949 }
 0x1f6   :  { %v1652_v2 = vpop.permute.xlu1 %1651 }
 0x1f7   :  { %1696 = vst.msk [vmem:[#allocation3 + $0x38] sm:$0xff] %vm987_vm6, %v1652_v2  ;;  %v1748_v33 = vpop.permute.xlu0 %1747 }
 0x1f8   :  { %1792 = vst.msk [vmem:[#allocation3 + $0x38] sm:$0xff] %vm1084_vm7, %v1748_v33 }
 0x1fb   :  { %482 = vrot.lane.b32.xlu2 %v3274_v34, %s2623_s18 }
 0x1fc   :  { %569 = vrot.lane.b32.xlu1 %v528_v35, %s2625_s20 }
 0x1fd   :  { %666 = vrot.lane.b32.xlu0 %v625_v36, %s2626_s0  ;;  %v1750_v4 = vpop.permute.xlu2 %1749 }
 0x1fe   :  { %v1176_v38 = vpop.permute.xlu1 %1175 }
 0x1ff   :  { %1218 = vst.msk [vmem:[#allocation3 + $0x58] sm:$0xff] %vm502_vm1, %v1176_v38  ;;  %v1174_v39 = vpop.permute.xlu0 %1173  ;;  %v1812_v10 = vld [vmem:[#allocation3 + $0x38] sm:$0xff] }
 0x200   :  { %1314 = vst.msk [vmem:[#allocation3 + $0x58] sm:$0xff] %vm599_vm2, %v1272_v17  ;;  %v1840_v61 = vpack.c.bf16 %v1812_v10, %v1810_v40  ;;  %v3372_v17 = vld [vmem:[#allocation2 + $0x83] sm:$0xff] }
 0x201   :  { %1217 = vst.msk [vmem:[#allocation3 + $0x48] sm:$0xff] %vm502_vm1, %v1174_v39 }
 0x202   :  { %2047 = vmatmul.bf16.gmra.mxu3 %v1840_v61 }
 0x203   :  { %1183 = vrot.lane.b32.xlu2 %v3245_v15, %s2623_s18 }
 0x204   :  { %1181 = vrot.lane.b32.xlu1 %v3230_v7, %s2623_s18 }
 0x205   :  { %761 = vrot.lane.b32.xlu0 %v3160_v23, %s2622_s13  ;;  %v566_v41 = vpop.permute.xlu2 %565  ;;  %v3303_v23 = vld [vmem:[#allocation2 + $0x7a] sm:$0xff] }
 0x206   :  { %v1270_v44 = vpop.permute.xlu1 %1269  ;;  %607 = vst.msk [vmem:[#allocation3 + $0x70] sm:$0xff] %vm599_vm2, %v566_v41 }
 0x207   :  { %v1368_v45 = vpop.permute.xlu0 %1367  ;;  %1313 = vst.msk [vmem:[#allocation3 + $0x48] sm:$0xff] %vm599_vm2, %v1270_v44  ;;  %v3408_v44 = vld [vmem:[#allocation2 + $0x8a] sm:$0xff] }
 0x208   :  { %1409 = vst.msk [vmem:[#allocation3 + $0x48] sm:$0xff] %vm696_vm3, %v1366_v22 }
 0x209   :  { %1410 = vst.msk [vmem:[#allocation3 + $0x58] sm:$0xff] %vm696_vm3, %v1368_v45 }
 0x20a   :  { %1506 = vst.msk [vmem:[#allocation3 + $0x58] sm:$0xff] %vm793_vm4, %v2914_v25 }
 0x20b   :  { %1602 = vst.msk [vmem:[#allocation3 + $0x58] sm:$0xff] %vm890_vm5, %v2886_v0  ;;  %1277 = vrot.lane.b32.xlu2 %v3295_v46, %s2625_s20 }
 0x20c   :  { %763 = vrot.lane.b32.xlu1 %v2934_v37, %s2622_s13  ;;  %1698 = vst.msk [vmem:[#allocation3 + $0x58] sm:$0xff] %vm987_vm6, %v2928_v32  ;;  %v3319_v32 = vld [vmem:[#allocation2 + $0x73] sm:$0xff] }
 0x20d   :  { %1279 = vrot.lane.b32.xlu0 %v3303_v23, %s2625_s20  ;;  %1794 = vst.msk [vmem:[#allocation3 + $0x58] sm:$0xff] %vm1084_vm7, %v2903_v19  ;;  %v1372_v25 = vpop.permute.xlu2 %1371  ;;  %v1994_v9 = vpop.f32.mrf.mxu2 }
 0x20e   :  { %v853_v47 = vpop.permute.xlu1 %852  ;;  %1412 = vst.msk [vmem:[#allocation3 + $0x78] sm:$0xff] %vm696_vm3, %v1372_v25  ;;  %v1995_v18 = vadd.f32 %v3368_v14, %v1994_v9 }
 0x20f   :  { %v1462_v0 = vpop.permute.xlu0 %1461  ;;  %896 = vst.msk [vmem:[#allocation3 + $0x50] sm:$0xff] %vm890_vm5, %v853_v47 }
 0x210   :  { %993 = vst.msk [vmem:[#allocation3 + $0x50] sm:$0xff] %vm987_vm6, %v950_v30 }
 0x211   :  { %1505 = vst.msk [vmem:[#allocation3 + $0x48] sm:$0xff] %vm793_vm4, %v1462_v0 }
 0x213   :  { %860 = vrot.lane.b32.xlu2 %v3230_v7, %s2621_s12 }
 0x214   :  { %858 = vrot.lane.b32.xlu1 %v3208_v52, %s2621_s12  ;;  %v1813_v52 = vld [vmem:[#allocation3 + $0x40] sm:$0xff]  ;;  %v1816_v59 = vld [vmem:[#allocation3 + $0x58] sm:$0xff] }
 0x215   :  { %1373 = vrot.lane.b32.xlu0 %v3319_v32, %s2626_s0  ;;  %v855_v19 = vpop.permute.xlu2 %854  ;;  %v1996_v27 = vpop.f32.mrf.mxu2 }
 0x216   :  { %v1558_v37 = vpop.permute.xlu1 %1557  ;;  %v1997_v29 = vadd.f32 %v3368_v14, %v1996_v27 }
 0x217   :  { %1601 = vst.msk [vmem:[#allocation3 + $0x48] sm:$0xff] %vm890_vm5, %v1558_v37  ;;  %v1047_v48 = vpop.permute.xlu0 %1046 }
 0x218   :  { %1090 = vst.msk [vmem:[#allocation3 + $0x50] sm:$0xff] %vm1084_vm7, %v1047_v48 }
 0x21b   :  { %955 = vrot.lane.b32.xlu2 %v528_v35, %s2624_s19 }
 0x21c   :  { %1375 = vrot.lane.b32.xlu1 %v3325_v49, %s2626_s0 }
 0x21d   :  { %957 = vrot.lane.b32.xlu0 %v3295_v46, %s2624_s19  ;;  %v1466_v24 = vpop.permute.xlu2 %1465 }
 0x21e   :  { %v564_v12 = vpop.permute.xlu1 %563 }
 0x21f   :  { %606 = vst.msk [vmem:[#allocation3 + $0x60] sm:$0xff] %vm599_vm2, %v564_v12  ;;  %v1654_v51 = vpop.permute.xlu0 %1653  ;;  %v1815_v13 = vld [vmem:[#allocation3 + $0x50] sm:$0xff] }
 0x220   :  { %1697 = vst.msk [vmem:[#allocation3 + $0x48] sm:$0xff] %vm987_vm6, %v1654_v51  ;;  %v1841_v53 = vpack.c.bf16 %v1815_v13, %v1813_v52  ;;  %v3458_v13 = vld [vmem:[#allocation2 + $0x92] sm:$0xff] }
 0x221   :  { %1793 = vst.msk [vmem:[#allocation3 + $0x48] sm:$0xff] %vm1084_vm7, %v1750_v4 }
 0x222   :  { %2003 = vmatmul.bf16.gmra.mxu2 %v1841_v53  ;;  %v3464_v53 = vld [vmem:[#allocation2 + $0x93] sm:$0xff] }
 0x223   :  { %1471 = vrot.lane.b32.xlu2 %v2965_v50, %s2622_s13 }
 0x224   :  { %1469 = vrot.lane.b32.xlu1 %v2951_v43, %s2622_s13 }
 0x225   :  { %1052 = vrot.lane.b32.xlu0 %v625_v36, %s2620_s11  ;;  %v471_v54 = vpop.permute.xlu2 %470 }
 0x226   :  { %v663_v55 = vpop.permute.xlu1 %662  ;;  %511 = vst.msk [vmem:[#allocation3 + $0x80] sm:$0xff] %vm502_vm1, %v471_v54 }
 0x227   :  { %v661_v57 = vpop.permute.xlu0 %660  ;;  %704 = vst.msk [vmem:[#allocation3 + $0x70] sm:$0xff] %vm696_vm3, %v663_v55 }
 0x228   :  { %v1814_v3 = vld [vmem:[#allocation3 + $0x48] sm:$0xff]  ;;  %801 = vst.msk [vmem:[#allocation3 + $0x70] sm:$0xff] %vm793_vm4, %v2949_v42 }
 0x229   :  { %v1842_v60 = vpack.c.bf16 %v1816_v59, %v1814_v3  ;;  %898 = vst.msk [vmem:[#allocation3 + $0x70] sm:$0xff] %vm890_vm5, %v2986_v58  ;;  %v3356_v58 = vld [vmem:[#allocation2 + $0x82] sm:$0xff] }
 0x22a   :  { %703 = vst.msk [vmem:[#allocation3 + $0x60] sm:$0xff] %vm696_vm3, %v661_v57 }
 0x22b   :  { %2052 = vmatmul.bf16.gmra.mxu3 %v1842_v60  ;;  %1565 = vrot.lane.b32.xlu2 %v3245_v15, %s2621_s12 }
 0x22c   :  { %1054 = vrot.lane.b32.xlu1 %v3319_v32, %s2620_s11 }
 0x22d   :  { %1567 = vrot.lane.b32.xlu0 %v3250_v16, %s2621_s12  ;;  %v1051_v1 = vpop.permute.xlu2 %1050 }
 0x22e   :  { %v758_v5 = vpop.permute.xlu1 %757 }
 0x22f   :  { %800 = vst.msk [vmem:[#allocation3 + $0x60] sm:$0xff] %vm793_vm4, %v758_v5  ;;  %v952_v42 = vpop.permute.xlu0 %951 }
 0x230   :  { %897 = vst.msk [vmem:[#allocation3 + $0x60] sm:$0xff] %vm890_vm5, %v855_v19 }
 0x231   :  { %994 = vst.msk [vmem:[#allocation3 + $0x60] sm:$0xff] %vm987_vm6, %v952_v42 }
 0x233   :  { %1663 = vrot.lane.b32.xlu2 %v3356_v58, %s2624_s19 }
 0x234   :  { %1661 = vrot.lane.b32.xlu1 %v3303_v23, %s2624_s19 }
 0x235   :  { %1757 = vrot.lane.b32.xlu0 %v3325_v49, %s2620_s11  ;;  %v1658_v7 = vpop.permute.xlu2 %1657 }
 0x236   :  { %v1370_v8 = vpop.permute.xlu1 %1369 }
 0x237   :  { %1411 = vst.msk [vmem:[#allocation3 + $0x68] sm:$0xff] %vm696_vm3, %v1370_v8  ;;  %v1468_v11 = vpop.permute.xlu0 %1467 }
 0x238   :  { %1507 = vst.msk [vmem:[#allocation3 + $0x68] sm:$0xff] %vm793_vm4, %v1466_v24 }
 0x239   :  { %1508 = vst.msk [vmem:[#allocation3 + $0x78] sm:$0xff] %vm793_vm4, %v1468_v11 }
 0x23b   :  { %571 = vrot.lane.b32.xlu2 %v3295_v46, %s2625_s20 }
 0x23c   :  { %1759 = vrot.lane.b32.xlu1 %v3372_v17, %s2620_s11 }
 0x23d   :  { %573 = vrot.lane.b32.xlu0 %v3303_v23, %s2625_s20  ;;  %v2043_v20 = vpop.f32.mrf.mxu3  ;;  %v477_v21 = vpop.permute.xlu2 %476 }
 0x23e   :  { %v3381_v63 = vadd.f32 %v2043_v20, %v1995_v18  ;;  %v954_v22 = vpop.permute.xlu1 %953  ;;  %514 = vst.msk [vmem:[#allocation3 + $0xb0] sm:$0xff] %vm502_vm1, %v477_v21 }
 0x23f   :  { %v473_v26 = vpop.permute.xlu0 %472  ;;  %995 = vst.msk [vmem:[#allocation3 + $0x70] sm:$0xff] %vm987_vm6, %v954_v22 }
 0x240   :  { %1092 = vst.msk [vmem:[#allocation3 + $0x70] sm:$0xff] %vm1084_vm7, %v1051_v1 }
 0x241   :  { %512 = vst.msk [vmem:[#allocation3 + $0x90] sm:$0xff] %vm502_vm1, %v473_v26 }
 0x243   :  { %670 = vrot.lane.b32.xlu2 %v3325_v49, %s2626_s0 }
 0x244   :  { %668 = vrot.lane.b32.xlu1 %v3319_v32, %s2626_s0 }
 0x245   :  { %1185 = vrot.lane.b32.xlu0 %v3250_v16, %s2623_s18  ;;  %v2045_v30 = vpop.f32.mrf.mxu3  ;;  %v1756_v33 = vpop.permute.xlu2 %1755 }
 0x246   :  { %v3394_v2 = vadd.f32 %v2045_v30, %v1997_v29  ;;  %v1049_v35 = vpop.permute.xlu1 %1048  ;;  %v3511_v30 = vld [vmem:[#allocation2 + $0x9a] sm:$0xff] }
 0x247   :  { %1091 = vst.msk [vmem:[#allocation3 + $0x60] sm:$0xff] %vm1084_vm7, %v1049_v35  ;;  %v1562_v36 = vpop.permute.xlu0 %1561  ;;  %v1819_v38 = vld [vmem:[#allocation3 + $0x70] sm:$0xff]  ;;  %v3522_v35 = vld [vmem:[#allocation2 + $0x9b] sm:$0xff] }
 0x248   :  { %1603 = vst.msk [vmem:[#allocation3 + $0x68] sm:$0xff] %vm890_vm5, %v1562_v36  ;;  %v2083_v4 = vpack.c.bf16 %v3394_v2, %v3381_v63 }
 0x249   :  { %1699 = vst.msk [vmem:[#allocation3 + $0x68] sm:$0xff] %vm987_vm6, %v1658_v7 }
 0x24b   :  { %765 = vrot.lane.b32.xlu2 %v2951_v43, %s2622_s13 }
 0x24c   :  { %1187 = vrot.lane.b32.xlu1 %v3265_v31, %s2623_s18 }
 0x24d   :  { %767 = vrot.lane.b32.xlu0 %v2965_v50, %s2622_s13  ;;  %v665_v39 = vpop.permute.xlu2 %664 }
 0x24e   :  { %v475_v40 = vpop.permute.xlu1 %474  ;;  %v1817_v10 = vld [vmem:[#allocation3 + $0x60] sm:$0xff]  ;;  %v1999_v57 = vpop.f32.mrf.mxu2 }
 0x24f   :  { %513 = vst.msk [vmem:[#allocation3 + $0xa0] sm:$0xff] %vm502_vm1, %v475_v40  ;;  %v1660_v61 = vpop.permute.xlu0 %1659  ;;  %v1843_v41 = vpack.c.bf16 %v1819_v38, %v1817_v10  ;;  %v2000_v59 = vadd.f32 %v3368_v14, %v1999_v57 }
 0x251   :  { %2008 = vmatmul.bf16.gmra.mxu2 %v1843_v41 }
 0x253   :  { %1283 = vrot.lane.b32.xlu2 %v3408_v44, %s2625_s20 }
 0x254   :  { %1281 = vrot.lane.b32.xlu1 %v3356_v58, %s2625_s20 }
 0x255   :  { %862 = vrot.lane.b32.xlu0 %v3245_v15, %s2621_s12  ;;  %v483_v43 = vpop.permute.xlu2 %482  ;;  %v3425_v15 = vld [vmem:[#allocation2 + $0x8b] sm:$0xff] }
 0x256   :  { %v1564_v50 = vpop.permute.xlu1 %1563  ;;  %517 = vst.msk [vmem:[#allocation3 + $0xe0] sm:$0xff] %vm502_vm1, %v483_v43  ;;  %v2001_v8 = vpop.f32.mrf.mxu2 }
 0x257   :  { %v479_v45 = vpop.permute.xlu0 %478  ;;  %1604 = vst.msk [vmem:[#allocation3 + $0x78] sm:$0xff] %vm890_vm5, %v1564_v50  ;;  %v2002_v9 = vadd.f32 %v3368_v14, %v2001_v8 }
 0x258   :  { %1700 = vst.msk [vmem:[#allocation3 + $0x78] sm:$0xff] %vm987_vm6, %v1660_v61 }
 0x259   :  { %1796 = vst.msk [vmem:[#allocation3 + $0x78] sm:$0xff] %vm1084_vm7, %v1756_v33 }
 0x25a   :  { %515 = vst.msk [vmem:[#allocation3 + $0xc0] sm:$0xff] %vm502_vm1, %v479_v45 }
 0x25b   :  { %1377 = vrot.lane.b32.xlu2 %v3372_v17, %s2626_s0 }
 0x25c   :  { %864 = vrot.lane.b32.xlu1 %v3250_v16, %s2621_s12 }
 0x25d   :  { %1379 = vrot.lane.b32.xlu0 %v3425_v15, %s2626_s0  ;;  %v1184_v46 = vpop.permute.xlu2 %1183 }
 0x25e   :  { %v1754_v25 = vpop.permute.xlu1 %1753  ;;  %1222 = vst.msk [vmem:[#allocation3 + $0x98] sm:$0xff] %vm502_vm1, %v1184_v46 }
 0x25f   :  { %v568_v47 = vpop.permute.xlu0 %567  ;;  %1795 = vst.msk [vmem:[#allocation3 + $0x68] sm:$0xff] %vm1084_vm7, %v1754_v25 }
 0x260   :  { %608 = vst.msk [vmem:[#allocation3 + $0x80] sm:$0xff] %vm599_vm2, %v568_v47  ;;  %v1820_v16 = vld [vmem:[#allocation3 + $0x78] sm:$0xff] }
 0x261   :  { %705 = vst.msk [vmem:[#allocation3 + $0x80] sm:$0xff] %vm696_vm3, %v665_v39 }
 0x263   :  { %961 = vrot.lane.b32.xlu2 %v3356_v58, %s2624_s19 }
 0x264   :  { %959 = vrot.lane.b32.xlu1 %v3303_v23, %s2624_s19 }
 0x265   :  { %1473 = vrot.lane.b32.xlu0 %v2976_v56, %s2622_s13  ;;  %v1278_v0 = vpop.permute.xlu2 %1277 }
 0x266   :  { %v481_v32 = vpop.permute.xlu1 %480  ;;  %v1818_v37 = vld [vmem:[#allocation3 + $0x68] sm:$0xff] }
 0x267   :  { %516 = vst.msk [vmem:[#allocation3 + $0xd0] sm:$0xff] %vm502_vm1, %v481_v32  ;;  %v485_v19 = vpop.permute.xlu0 %484  ;;  %v1844_v48 = vpack.c.bf16 %v1820_v16, %v1818_v37 }
 0x268   :  { %518 = vst.msk [vmem:[#allocation3 + $0xf0] sm:$0xff] %vm502_vm1, %v485_v19 }
 0x269   :  { %2057 = vmatmul.bf16.gmra.mxu3 %v1844_v48 }
 0x26b   :  { %1056 = vrot.lane.b32.xlu2 %v3325_v49, %s2620_s11 }
 0x26c   :  { %1475 = vrot.lane.b32.xlu1 %v3222_v62, %s2622_s13 }
 0x26d   :  { %1058 = vrot.lane.b32.xlu0 %v3372_v17, %s2620_s11  ;;  %v861_v23 = vpop.permute.xlu2 %860 }
 0x26e   :  { %v570_v24 = vpop.permute.xlu1 %569 }
 0x26f   :  { %609 = vst.msk [vmem:[#allocation3 + $0x90] sm:$0xff] %vm599_vm2, %v570_v24  ;;  %v667_v12 = vpop.permute.xlu0 %666  ;;  %v1530_v24 = vld [vmem:[#allocation2 + $0xa1] sm:$0xff] }
 0x270   :  { %706 = vst.msk [vmem:[#allocation3 + $0x90] sm:$0xff] %vm696_vm3, %v667_v12  ;;  %v3558_v12 = vld [vmem:[#allocation2 + $0xa2] sm:$0xff] }
 0x273   :  { %1571 = vrot.lane.b32.xlu2 %v3274_v34, %s2621_s12 }
 0x274   :  { %1569 = vrot.lane.b32.xlu1 %v3265_v31, %s2621_s12 }
 0x275   :  { %1665 = vrot.lane.b32.xlu0 %v3408_v44, %s2624_s19  ;;  %v956_v49 = vpop.permute.xlu2 %955 }
 0x276   :  { %v1182_v51 = vpop.permute.xlu1 %1181 }
 0x277   :  { %1221 = vst.msk [vmem:[#allocation3 + $0x88] sm:$0xff] %vm502_vm1, %v1182_v51  ;;  %v762_v52 = vpop.permute.xlu0 %761 }
 0x278   :  { %1317 = vst.msk [vmem:[#allocation3 + $0x88] sm:$0xff] %vm599_vm2, %v1278_v0 }
 0x279   :  { %802 = vst.msk [vmem:[#allocation3 + $0x80] sm:$0xff] %vm793_vm4, %v762_v52 }
 0x27b   :  { %1761 = vrot.lane.b32.xlu2 %v3425_v15, %s2620_s11 }
 0x27c   :  { %1667 = vrot.lane.b32.xlu1 %v3458_v13, %s2624_s19 }
 0x27d   :  { %1763 = vrot.lane.b32.xlu0 %v3464_v53, %s2620_s11  ;;  %v1472_v54 = vpop.permute.xlu2 %1471 }
 0x27e   :  { %v764_v55 = vpop.permute.xlu1 %763 }
 0x27f   :  { %803 = vst.msk [vmem:[#allocation3 + $0x90] sm:$0xff] %vm793_vm4, %v764_v55  ;;  %v1280_v3 = vpop.permute.xlu0 %1279 }
 0x280   :  { %900 = vst.msk [vmem:[#allocation3 + $0x90] sm:$0xff] %vm890_vm5, %v861_v23 }
 0x281   :  { %1318 = vst.msk [vmem:[#allocation3 + $0x98] sm:$0xff] %vm599_vm2, %v1280_v3 }
 0x283   :  { %577 = vrot.lane.b32.xlu2 %v3408_v44, %s2625_s20 }
 0x284   :  { %575 = vrot.lane.b32.xlu1 %v3356_v58, %s2625_s20  ;;  %v3488_v58 = vld [vmem:[#allocation2 + $0xa0] sm:$0xff] }
 0x285   :  { %672 = vrot.lane.b32.xlu0 %v3372_v17, %s2626_s0  ;;  %v2048_v60 = vpop.f32.mrf.mxu3  ;;  %v1566_v5 = vpop.permute.xlu2 %1565  ;;  %1131 = vst.msk [vmem:[#allocation3 + $0xe8] sm:$0xff] %vm365_vm0, %v3488_v58 }
 0x286   :  { %v3478_v1 = vadd.f32 %v2048_v60, %v2000_v59  ;;  %v859_v42 = vpop.permute.xlu1 %858 }
 0x287   :  { %899 = vst.msk [vmem:[#allocation3 + $0x80] sm:$0xff] %vm890_vm5, %v859_v42  ;;  %v1374_v7 = vpop.permute.xlu0 %1373  ;;  %v1435_v42 = vld [vmem:[#allocation2 + $0xa8] sm:$0xff] }
 0x288   :  { %996 = vst.msk [vmem:[#allocation3 + $0x80] sm:$0xff] %vm987_vm6, %v956_v49 }
 0x289   :  { %1413 = vst.msk [vmem:[#allocation3 + $0x88] sm:$0xff] %vm696_vm3, %v1374_v7 }
 0x28a   :  { %1132 = vst.msk [vmem:[#allocation3 + $0xf8] sm:$0xff] %vm365_vm0, %v1435_v42 }
 0x28b   :  { %1189 = vrot.lane.b32.xlu2 %v3274_v34, %s2623_s18 }
 0x28c   :  { %674 = vrot.lane.b32.xlu1 %v3425_v15, %s2626_s0 }
 0x28d   :  { %1191 = vrot.lane.b32.xlu0 %v3263_v28, %s2623_s18  ;;  %v2050_v11 = vpop.f32.mrf.mxu3  ;;  %v1664_v18 = vpop.permute.xlu2 %1663 }
 0x28e   :  { %v3494_v17 = vadd.f32 %v2050_v11, %v2002_v9  ;;  %v1376_v20 = vpop.permute.xlu1 %1375  ;;  %v1244_v9 = vld [vmem:[#allocation2 + $0xaa] sm:$0xff] }
 0x28f   :  { %1414 = vst.msk [vmem:[#allocation3 + $0x98] sm:$0xff] %vm696_vm3, %v1376_v20  ;;  %v958_v21 = vpop.permute.xlu0 %957 }
 0x290   :  { %1510 = vst.msk [vmem:[#allocation3 + $0x98] sm:$0xff] %vm793_vm4, %v1472_v54  ;;  %v2084_v22 = vpack.c.bf16 %v3494_v17, %v3478_v1  ;;  %v3567_v54 = vld [vmem:[#allocation2 + $0xa3] sm:$0xff]  ;;  %v2576_v1 = vld [vmem:[%s3792_s5 + $0x18] sm:$0xff] }
 0x291   :  { %997 = vst.msk [vmem:[#allocation3 + $0x90] sm:$0xff] %vm987_vm6, %v958_v21 }
 0x293   :  { %771 = vrot.lane.b32.xlu2 %v3222_v62, %s2622_s13 }
 0x294   :  { %769 = vrot.lane.b32.xlu1 %v2976_v56, %s2622_s13 }
 0x295   :  { %1285 = vrot.lane.b32.xlu0 %v3458_v13, %s2625_s20  ;;  %v572_v26 = vpop.permute.xlu2 %571 }
 0x296   :  { %v1470_v27 = vpop.permute.xlu1 %1469  ;;  %610 = vst.msk [vmem:[#allocation3 + $0xa0] sm:$0xff] %vm599_vm2, %v572_v26 }
 0x297   :  { %v1053_v29 = vpop.permute.xlu0 %1052  ;;  %1509 = vst.msk [vmem:[#allocation3 + $0x88] sm:$0xff] %vm793_vm4, %v1470_v27 }
 0x298   :  { %1605 = vst.msk [vmem:[#allocation3 + $0x88] sm:$0xff] %vm890_vm5, %v1566_v5  ;;  %v3587_v5 = vld [vmem:[#allocation2 + $0xa9] sm:$0xff] }
 0x299   :  { %1093 = vst.msk [vmem:[#allocation3 + $0x80] sm:$0xff] %vm1084_vm7, %v1053_v29 }
 0x29b   :  { %866 = vrot.lane.b32.xlu2 %v3265_v31, %s2621_s12 }
 0x29c   :  { %1287 = vrot.lane.b32.xlu1 %v3511_v30, %s2625_s20 }
 0x29d   :  { %868 = vrot.lane.b32.xlu0 %v3274_v34, %s2621_s12  ;;  %v671_v56 = vpop.permute.xlu2 %670 }
 0x29e   :  { %v1055_v62 = vpop.permute.xlu1 %1054 }
 0x29f   :  { %1094 = vst.msk [vmem:[#allocation3 + $0x90] sm:$0xff] %vm1084_vm7, %v1055_v62  ;;  %v1568_v33 = vpop.permute.xlu0 %1567  ;;  %v1340_v62 = vld [vmem:[#allocation2 + $0xab] sm:$0xff] }
 0x2a0   :  { %1606 = vst.msk [vmem:[#allocation3 + $0x98] sm:$0xff] %vm890_vm5, %v1568_v33  ;;  %v1821_v36 = vld [vmem:[#allocation3 + $0x80] sm:$0xff] }
 0x2a1   :  { %1702 = vst.msk [vmem:[#allocation3 + $0x98] sm:$0xff] %vm987_vm6, %v1664_v18 }
 0x2a3   :  { %1383 = vrot.lane.b32.xlu2 %v3522_v35, %s2626_s0 }
 0x2a4   :  { %1381 = vrot.lane.b32.xlu1 %v3464_v53, %s2626_s0 }
 0x2a5   :  { %963 = vrot.lane.b32.xlu0 %v3408_v44, %s2624_s19  ;;  %v766_v31 = vpop.permute.xlu2 %765  ;;  %v2004_v10 = vpop.f32.mrf.mxu2 }
 0x2a6   :  { %v1662_v34 = vpop.permute.xlu1 %1661  ;;  %v1823_v38 = vld [vmem:[#allocation3 + $0x90] sm:$0xff]  ;;  %v2005_v61 = vadd.f32 %v3368_v14, %v2004_v10 }
 0x2a7   :  { %1701 = vst.msk [vmem:[#allocation3 + $0x88] sm:$0xff] %vm987_vm6, %v1662_v34  ;;  %v1758_v39 = vpop.permute.xlu0 %1757  ;;  %v1845_v40 = vpack.c.bf16 %v1823_v38, %v1821_v36 }
 0x2a8   :  { %1797 = vst.msk [vmem:[#allocation3 + $0x88] sm:$0xff] %vm1084_vm7, %v1758_v39  ;;  %v1436_v39 = vld [vmem:[#allocation2 + $0xb0] sm:$0xff] }
 0x2a9   :  { %2013 = vmatmul.bf16.gmra.mxu2 %v1845_v40 }
 0x2ab   :  { %1477 = vrot.lane.b32.xlu2 %v3228_v6, %s2622_s13 }
 0x2ac   :  { %965 = vrot.lane.b32.xlu1 %v3458_v13, %s2624_s19 }
 0x2ad   :  { %1479 = vrot.lane.b32.xlu0 %v3488_v58, %s2622_s13  ;;  %v1284_v44 = vpop.permute.xlu2 %1283  ;;  %v2006_v46 = vpop.f32.mrf.mxu2 }
 0x2ae   :  { %v2053_v41 = vpop.f32.mrf.mxu3  ;;  %v1760_v50 = vpop.permute.xlu1 %1759  ;;  %v2007_v25 = vadd.f32 %v3368_v14, %v2006_v46 }
 0x2af   :  { %v3539_v43 = vadd.f32 %v2053_v41, %v2005_v61  ;;  %v574_v45 = vpop.permute.xlu0 %573  ;;  %1798 = vst.msk [vmem:[#allocation3 + $0x98] sm:$0xff] %vm1084_vm7, %v1760_v50  ;;  %v1822_v37 = vld [vmem:[#allocation3 + $0x88] sm:$0xff]  ;;  %v1532_v50 = vld [vmem:[#allocation2 + $0xb1] sm:$0xff] }
 0x2b0   :  { %611 = vst.msk [vmem:[#allocation3 + $0xb0] sm:$0xff] %vm599_vm2, %v574_v45 }
 0x2b1   :  { %708 = vst.msk [vmem:[#allocation3 + $0xb0] sm:$0xff] %vm696_vm3, %v671_v56 }
 0x2b3   :  { %1062 = vrot.lane.b32.xlu2 %v3464_v53, %s2620_s11 }
 0x2b4   :  { %1060 = vrot.lane.b32.xlu1 %v3425_v15, %s2620_s11 }
 0x2b5   :  { %1573 = vrot.lane.b32.xlu0 %v3263_v28, %s2621_s12  ;;  %v1378_v16 = vpop.permute.xlu2 %1377 }
 0x2b6   :  { %v2055_v47 = vpop.f32.mrf.mxu3  ;;  %v669_v32 = vpop.permute.xlu1 %668  ;;  %v1824_v48 = vld [vmem:[#allocation3 + $0x98] sm:$0xff] }
 0x2b7   :  { %v3551_v0 = vadd.f32 %v2055_v47, %v2007_v25  ;;  %v1186_v19 = vpop.permute.xlu0 %1185  ;;  %707 = vst.msk [vmem:[#allocation3 + $0xa0] sm:$0xff] %vm696_vm3, %v669_v32  ;;  %v1846_v23 = vpack.c.bf16 %v1824_v48, %v1822_v37  ;;  %v1628_v25 = vld [vmem:[#allocation2 + $0xb2] sm:$0xff] }
 0x2b8   :  { %804 = vst.msk [vmem:[#allocation3 + $0xa0] sm:$0xff] %vm793_vm4, %v766_v31 }
 0x2b9   :  { %v2085_v15 = vpack.c.bf16 %v3551_v0, %v3539_v43  ;;  %1223 = vst.msk [vmem:[#allocation3 + $0xa8] sm:$0xff] %vm502_vm1, %v1186_v19  ;;  %2062 = vmatmul.bf16.gmra.mxu3 %v1846_v23  ;;  %v1724_v19 = vld [vmem:[#allocation2 + $0xb3] sm:$0xff] }
 0x2ba   :  { %v2575_v43 = vld [vmem:[%s3792_s5 + $0x10] sm:$0xff] }
 0x2bb   :  { %1669 = vrot.lane.b32.xlu2 %v3511_v30, %s2624_s19 }
 0x2bc   :  { %1575 = vrot.lane.b32.xlu1 %v1530_v24, %s2621_s12 }
 0x2bd   :  { %1671 = vrot.lane.b32.xlu0 %v3558_v12, %s2624_s19  ;;  %v962_v49 = vpop.permute.xlu2 %961 }
 0x2be   :  { %v1188_v51 = vpop.permute.xlu1 %1187 }
 0x2bf   :  { %v768_v52 = vpop.permute.xlu0 %767  ;;  %1224 = vst.msk [vmem:[#allocation3 + $0xb8] sm:$0xff] %vm502_vm1, %v1188_v51 }
 0x2c0   :  { %1320 = vst.msk [vmem:[#allocation3 + $0xb8] sm:$0xff] %vm599_vm2, %v1284_v44 }
 0x2c1   :  { %805 = vst.msk [vmem:[#allocation3 + $0xb0] sm:$0xff] %vm793_vm4, %v768_v52 }
 0x2c3   :  { %1767 = vrot.lane.b32.xlu2 %v3567_v54, %s2620_s11 }
 0x2c4   :  { %1765 = vrot.lane.b32.xlu1 %v3522_v35, %s2620_s11 }
 0x2c5   :  { %579 = vrot.lane.b32.xlu0 %v3458_v13, %s2625_s20  ;;  %v1057_v55 = vpop.permute.xlu2 %1056 }
 0x2c6   :  { %v1282_v57 = vpop.permute.xlu1 %1281 }
 0x2c7   :  { %v863_v3 = vpop.permute.xlu0 %862  ;;  %1319 = vst.msk [vmem:[#allocation3 + $0xa8] sm:$0xff] %vm599_vm2, %v1282_v57 }
 0x2c8   :  { %1415 = vst.msk [vmem:[#allocation3 + $0xa8] sm:$0xff] %vm696_vm3, %v1378_v16 }
 0x2c9   :  { %901 = vst.msk [vmem:[#allocation3 + $0xa0] sm:$0xff] %vm890_vm5, %v863_v3 }
 0x2cb   :  { %676 = vrot.lane.b32.xlu2 %v3464_v53, %s2626_s0 }
 0x2cc   :  { %581 = vrot.lane.b32.xlu1 %v3511_v30, %s2625_s20 }
 0x2cd   :  { %678 = vrot.lane.b32.xlu0 %v3522_v35, %s2626_s0  ;;  %v1572_v59 = vpop.permute.xlu2 %1571 }
 0x2ce   :  { %v865_v13 = vpop.permute.xlu1 %864 }
 0x2cf   :  { %v1380_v60 = vpop.permute.xlu0 %1379  ;;  %902 = vst.msk [vmem:[#allocation3 + $0xb0] sm:$0xff] %vm890_vm5, %v865_v13 }
 0x2d0   :  { %999 = vst.msk [vmem:[#allocation3 + $0xb0] sm:$0xff] %vm987_vm6, %v962_v49 }
 0x2d1   :  { %1416 = vst.msk [vmem:[#allocation3 + $0xb8] sm:$0xff] %vm696_vm3, %v1380_v60 }
 0x2d3   :  { %1195 = vrot.lane.b32.xlu2 %v3587_v5, %s2623_s18 }
 0x2d4   :  { %1193 = vrot.lane.b32.xlu1 %v1530_v24, %s2623_s18  ;;  %v2009_v26 = vpop.f32.mrf.mxu2 }
 0x2d5   :  { %773 = vrot.lane.b32.xlu0 %v3228_v6, %s2622_s13  ;;  %v1762_v53 = vpop.permute.xlu2 %1761 }
 0x2d6   :  { %v960_v7 = vpop.permute.xlu1 %959 }
 0x2d7   :  { %v1474_v8 = vpop.permute.xlu0 %1473  ;;  %998 = vst.msk [vmem:[#allocation3 + $0xa0] sm:$0xff] %vm987_vm6, %v960_v7 }
 0x2d8   :  { %1095 = vst.msk [vmem:[#allocation3 + $0xa0] sm:$0xff] %vm1084_vm7, %v1057_v55 }
 0x2d9   :  { %1511 = vst.msk [vmem:[#allocation3 + $0xa8] sm:$0xff] %vm793_vm4, %v1474_v8 }
 0x2db   :  { %1289 = vrot.lane.b32.xlu2 %v3558_v12, %s2625_s20 }
 0x2dc   :  { %775 = vrot.lane.b32.xlu1 %v3488_v58, %s2622_s13  ;;  %v3662_v7 = vpop.f32.mrf.mxu2 }
 0x2dd   :  { %1291 = vrot.lane.b32.xlu0 %v1244_v9, %s2625_s20  ;;  %v578_v11 = vpop.permute.xlu2 %577 }
 0x2de   :  { %613 = vst.msk [vmem:[#allocation3 + $0xd0] sm:$0xff] %vm599_vm2, %v578_v11  ;;  %v1476_v6 = vpop.permute.xlu1 %1475 }
 0x2df   :  { %v1059_v18 = vpop.permute.xlu0 %1058  ;;  %1512 = vst.msk [vmem:[#allocation3 + $0xb8] sm:$0xff] %vm793_vm4, %v1476_v6  ;;  %v1825_v27 = vld [vmem:[#allocation3 + $0xa0] sm:$0xff] }
 0x2e0   :  { %1608 = vst.msk [vmem:[#allocation3 + $0xb8] sm:$0xff] %vm890_vm5, %v1572_v59 }
 0x2e1   :  { %1096 = vst.msk [vmem:[#allocation3 + $0xb0] sm:$0xff] %vm1084_vm7, %v1059_v18 }
 0x2e3   :  { %872 = vrot.lane.b32.xlu2 %v1530_v24, %s2621_s12 }
 0x2e4   :  { %870 = vrot.lane.b32.xlu1 %v3263_v28, %s2621_s12  ;;  %v2010_v28 = vadd.f32 %v3368_v14, %v2009_v26 }
 0x2e5   :  { %1385 = vrot.lane.b32.xlu0 %v3567_v54, %s2626_s0  ;;  %v1190_v58 = vpop.permute.xlu2 %1189 }
 0x2e6   :  { %1225 = vst.msk [vmem:[#allocation3 + $0xc8] sm:$0xff] %vm502_vm1, %v1190_v58  ;;  %v1570_v20 = vpop.permute.xlu1 %1569 }
 0x2e7   :  { %v1666_v21 = vpop.permute.xlu0 %1665  ;;  %1607 = vst.msk [vmem:[#allocation3 + $0xa8] sm:$0xff] %vm890_vm5, %v1570_v20 }
 0x2e8   :  { %1703 = vst.msk [vmem:[#allocation3 + $0xa8] sm:$0xff] %vm987_vm6, %v1666_v21  ;;  %v1827_v29 = vld [vmem:[#allocation3 + $0xb0] sm:$0xff] }
 0x2e9   :  { %1799 = vst.msk [vmem:[#allocation3 + $0xa8] sm:$0xff] %vm1084_vm7, %v1762_v53  ;;  %v1847_v56 = vpack.c.bf16 %v1827_v29, %v1825_v27 }
 0x2eb   :  { %2018 = vmatmul.bf16.gmra.mxu2 %v1847_v56  ;;  %967 = vrot.lane.b32.xlu2 %v3511_v30, %s2624_s19 }
 0x2ec   :  { %1387 = vrot.lane.b32.xlu1 %v1340_v62, %s2626_s0  ;;  %v2058_v33 = vpop.f32.mrf.mxu3 }
 0x2ed   :  { %969 = vrot.lane.b32.xlu0 %v3558_v12, %s2624_s19  ;;  %v3623_v31 = vadd.f32 %v2058_v33, %v2010_v28  ;;  %v772_v34 = vpop.permute.xlu2 %771 }
 0x2ee   :  { %v1668_v36 = vpop.permute.xlu1 %1667 }
 0x2ef   :  { %v1764_v38 = vpop.permute.xlu0 %1763  ;;  %1704 = vst.msk [vmem:[#allocation3 + $0xb8] sm:$0xff] %vm987_vm6, %v1668_v36 }
 0x2f0   :  { %1800 = vst.msk [vmem:[#allocation3 + $0xb8] sm:$0xff] %vm1084_vm7, %v1764_v38  ;;  %v1826_v61 = vld [vmem:[#allocation3 + $0xa8] sm:$0xff] }
 0x2f3   :  { %1483 = vrot.lane.b32.xlu2 %v1436_v39, %s2622_s13 }
 0x2f4   :  { %1481 = vrot.lane.b32.xlu1 %v1435_v42, %s2622_s13  ;;  %v3666_v8 = vpop.f32.mrf.mxu3 }
 0x2f5   :  { %1064 = vrot.lane.b32.xlu0 %v3522_v35, %s2620_s11  ;;  %v867_v30 = vpop.permute.xlu2 %866 }
 0x2f6   :  { %v576_v40 = vpop.permute.xlu1 %575 }
 0x2f7   :  { %v673_v10 = vpop.permute.xlu0 %672  ;;  %612 = vst.msk [vmem:[#allocation3 + $0xc0] sm:$0xff] %vm599_vm2, %v576_v40  ;;  %v1828_v41 = vld [vmem:[#allocation3 + $0xb8] sm:$0xff] }
 0x2f8   :  { %709 = vst.msk [vmem:[#allocation3 + $0xc0] sm:$0xff] %vm696_vm3, %v673_v10  ;;  %v1848_v44 = vpack.c.bf16 %v1828_v41, %v1826_v61 }
 0x2fa   :  { %2067 = vmatmul.bf16.gmra.mxu3 %v1848_v44 }
 0x2fb   :  { %1577 = vrot.lane.b32.xlu2 %v3587_v5, %s2621_s12 }
 0x2fc   :  { %1066 = vrot.lane.b32.xlu1 %v3567_v54, %s2620_s11 }
 0x2fd   :  { %1579 = vrot.lane.b32.xlu0 %v1532_v50, %s2621_s12  ;;  %v1384_v35 = vpop.permute.xlu2 %1383 }
 0x2fe   :  { %v675_v45 = vpop.permute.xlu1 %674 }
 0x2ff   :  { %v1192_v46 = vpop.permute.xlu0 %1191  ;;  %710 = vst.msk [vmem:[#allocation3 + $0xd0] sm:$0xff] %vm696_vm3, %v675_v45 }
 0x300   :  { %807 = vst.msk [vmem:[#allocation3 + $0xd0] sm:$0xff] %vm793_vm4, %v772_v34 }
 0x301   :  { %1226 = vst.msk [vmem:[#allocation3 + $0xd8] sm:$0xff] %vm502_vm1, %v1192_v46 }
 0x303   :  { %1675 = vrot.lane.b32.xlu2 %v1628_v25, %s2624_s19 }
 0x304   :  { %1673 = vrot.lane.b32.xlu1 %v1244_v9, %s2624_s19 }
 0x305   :  { %1769 = vrot.lane.b32.xlu0 %v1340_v62, %s2620_s11  ;;  %v1478_v47 = vpop.permute.xlu2 %1477 }
 0x306   :  { %v770_v16 = vpop.permute.xlu1 %769 }
 0x307   :  { %v1286_v32 = vpop.permute.xlu0 %1285  ;;  %806 = vst.msk [vmem:[#allocation3 + $0xc0] sm:$0xff] %vm793_vm4, %v770_v16 }
 0x308   :  { %903 = vst.msk [vmem:[#allocation3 + $0xc0] sm:$0xff] %vm890_vm5, %v867_v30 }
 0x309   :  { %1321 = vst.msk [vmem:[#allocation3 + $0xc8] sm:$0xff] %vm599_vm2, %v1286_v32 }
 0x30c   :  { %1771 = vrot.lane.b32.xlu1 %v1724_v19, %s2620_s11 }
 0x30d   :  { %v1063_v37 = vpop.permute.xlu2 %1062 }
 0x30e   :  { %v1288_v48 = vpop.permute.xlu1 %1287 }
 0x30f   :  { %v869_v23 = vpop.permute.xlu0 %868  ;;  %1322 = vst.msk [vmem:[#allocation3 + $0xd8] sm:$0xff] %vm599_vm2, %v1288_v48 }
 0x310   :  { %1418 = vst.msk [vmem:[#allocation3 + $0xd8] sm:$0xff] %vm696_vm3, %v1384_v35 }
 0x311   :  { %904 = vst.msk [vmem:[#allocation3 + $0xd0] sm:$0xff] %vm890_vm5, %v869_v23 }
 0x315   :  { %v1670_v24 = vpop.permute.xlu2 %1669 }
 0x316   :  { %v1382_v12 = vpop.permute.xlu1 %1381 }
 0x317   :  { %v964_v49 = vpop.permute.xlu0 %963  ;;  %1417 = vst.msk [vmem:[#allocation3 + $0xc8] sm:$0xff] %vm696_vm3, %v1382_v12 }
 0x318   :  { %1513 = vst.msk [vmem:[#allocation3 + $0xc8] sm:$0xff] %vm793_vm4, %v1478_v47 }
 0x319   :  { %1000 = vst.msk [vmem:[#allocation3 + $0xc0] sm:$0xff] %vm987_vm6, %v964_v49 }
 0x31d   :  { %v1768_v51 = vpop.permute.xlu2 %1767 }
 0x31e   :  { %v966_v52 = vpop.permute.xlu1 %965 }
 0x31f   :  { %v1480_v54 = vpop.permute.xlu0 %1479  ;;  %1001 = vst.msk [vmem:[#allocation3 + $0xd0] sm:$0xff] %vm987_vm6, %v966_v52 }
 0x320   :  { %1098 = vst.msk [vmem:[#allocation3 + $0xd0] sm:$0xff] %vm1084_vm7, %v1063_v37 }
 0x321   :  { %1514 = vst.msk [vmem:[#allocation3 + $0xd8] sm:$0xff] %vm793_vm4, %v1480_v54 }
 0x325   :  { %v677_v55 = vpop.permute.xlu2 %676 }
 0x326   :  { %v1061_v57 = vpop.permute.xlu1 %1060 }
 0x327   :  { %v1574_v3 = vpop.permute.xlu0 %1573  ;;  %1097 = vst.msk [vmem:[#allocation3 + $0xc0] sm:$0xff] %vm1084_vm7, %v1061_v57  ;;  %v1831_v42 = vld [vmem:[#allocation3 + $0xd0] sm:$0xff] }
 0x328   :  { %1609 = vst.msk [vmem:[#allocation3 + $0xc8] sm:$0xff] %vm890_vm5, %v1574_v3 }
 0x329   :  { %1705 = vst.msk [vmem:[#allocation3 + $0xc8] sm:$0xff] %vm987_vm6, %v1670_v24 }
 0x32c   :  { %v2014_v6 = vpop.f32.mrf.mxu2 }
 0x32d   :  { %v1196_v59 = vpop.permute.xlu2 %1195  ;;  %v2015_v18 = vadd.f32 %v3368_v14, %v2014_v6 }
 0x32e   :  { %1228 = vst.msk [vmem:[#allocation3 + $0xf8] sm:$0xff] %vm502_vm1, %v1196_v59  ;;  %v1576_v13 = vpop.permute.xlu1 %1575  ;;  %v1829_v5 = vld [vmem:[#allocation3 + $0xc0] sm:$0xff] }
 0x32f   :  { %v1672_v60 = vpop.permute.xlu0 %1671  ;;  %1610 = vst.msk [vmem:[#allocation3 + $0xd8] sm:$0xff] %vm890_vm5, %v1576_v13  ;;  %v1849_v53 = vpack.c.bf16 %v1831_v42, %v1829_v5 }
 0x330   :  { %1706 = vst.msk [vmem:[#allocation3 + $0xd8] sm:$0xff] %vm987_vm6, %v1672_v60 }
 0x331   :  { %1802 = vst.msk [vmem:[#allocation3 + $0xd8] sm:$0xff] %vm1084_vm7, %v1768_v51  ;;  %2023 = vmatmul.bf16.gmra.mxu2 %v1849_v53 }
 0x334   :  { %v2016_v49 = vpop.f32.mrf.mxu2 }
 0x335   :  { %v1290_v21 = vpop.permute.xlu2 %1289 }
 0x336   :  { %v1766_v9 = vpop.permute.xlu1 %1765 }
 0x337   :  { %v580_v11 = vpop.permute.xlu0 %579  ;;  %1801 = vst.msk [vmem:[#allocation3 + $0xc8] sm:$0xff] %vm1084_vm7, %v1766_v9 }
 0x338   :  { %614 = vst.msk [vmem:[#allocation3 + $0xe0] sm:$0xff] %vm599_vm2, %v580_v11  ;;  %v1832_v20 = vld [vmem:[#allocation3 + $0xd8] sm:$0xff] }
 0x339   :  { %711 = vst.msk [vmem:[#allocation3 + $0xe0] sm:$0xff] %vm696_vm3, %v677_v55 }
 0x33c   :  { %v2063_v58 = vpop.f32.mrf.mxu3 }
 0x33d   :  { %v3672_v26 = vadd.f32 %v2063_v58, %v2015_v18  ;;  %v873_v34 = vpop.permute.xlu2 %872 }
 0x33e   :  { %v582_v27 = vpop.permute.xlu1 %581  ;;  %v1830_v56 = vld [vmem:[#allocation3 + $0xc8] sm:$0xff] }
 0x33f   :  { %v679_v29 = vpop.permute.xlu0 %678  ;;  %615 = vst.msk [vmem:[#allocation3 + $0xf0] sm:$0xff] %vm599_vm2, %v582_v27  ;;  %v1850_v62 = vpack.c.bf16 %v1832_v20, %v1830_v56 }
 0x340   :  { %712 = vst.msk [vmem:[#allocation3 + $0xf0] sm:$0xff] %vm696_vm3, %v679_v29 }
 0x341   :  { %2072 = vmatmul.bf16.gmra.mxu3 %v1850_v62 }
 0x344   :  { %v2065_v51 = vpop.f32.mrf.mxu3 }
 0x345   :  { %v968_v39 = vpop.permute.xlu2 %967 }
 0x346   :  { %v1194_v28 = vpop.permute.xlu1 %1193 }
 0x347   :  { %v774_v33 = vpop.permute.xlu0 %773  ;;  %1227 = vst.msk [vmem:[#allocation3 + $0xe8] sm:$0xff] %vm502_vm1, %v1194_v28 }
 0x348   :  { %1323 = vst.msk [vmem:[#allocation3 + $0xe8] sm:$0xff] %vm599_vm2, %v1290_v21 }
 0x349   :  { %808 = vst.msk [vmem:[#allocation3 + $0xe0] sm:$0xff] %vm793_vm4, %v774_v33 }
 0x34d   :  { %v1484_v10 = vpop.permute.xlu2 %1483 }
 0x34e   :  { %v776_v36 = vpop.permute.xlu1 %775 }
 0x34f   :  { %v1292_v38 = vpop.permute.xlu0 %1291  ;;  %809 = vst.msk [vmem:[#allocation3 + $0xf0] sm:$0xff] %vm793_vm4, %v776_v36  ;;  %v2017_v36 = vadd.f32 %v3368_v14, %v2016_v49 }
 0x350   :  { %906 = vst.msk [vmem:[#allocation3 + $0xf0] sm:$0xff] %vm890_vm5, %v873_v34 }
 0x351   :  { %1324 = vst.msk [vmem:[#allocation3 + $0xf8] sm:$0xff] %vm599_vm2, %v1292_v38 }
 0x355   :  { %v1578_v44 = vpop.permute.xlu2 %1577 }
 0x356   :  { %v871_v30 = vpop.permute.xlu1 %870 }
 0x357   :  { %v1386_v40 = vpop.permute.xlu0 %1385  ;;  %905 = vst.msk [vmem:[#allocation3 + $0xe0] sm:$0xff] %vm890_vm5, %v871_v30 }
 0x358   :  { %1002 = vst.msk [vmem:[#allocation3 + $0xe0] sm:$0xff] %vm987_vm6, %v968_v39  ;;  %v2066_v39 = vadd.f32 %v2065_v51, %v2017_v36 }
 0x359   :  { %1419 = vst.msk [vmem:[#allocation3 + $0xe8] sm:$0xff] %vm696_vm3, %v1386_v40  ;;  %v2012_v40 = vadd.f32 %v3368_v14, %v3662_v7 }
 0x35d   :  { %v1676_v46 = vpop.permute.xlu2 %1675 }
 0x35e   :  { %v1388_v61 = vpop.permute.xlu1 %1387 }
 0x35f   :  { %v970_v41 = vpop.permute.xlu0 %969  ;;  %1420 = vst.msk [vmem:[#allocation3 + $0xf8] sm:$0xff] %vm696_vm3, %v1388_v61  ;;  %v2087_v61 = vpack.c.bf16 %v2066_v39, %v3672_v26 }
 0x360   :  { %1003 = vst.msk [vmem:[#allocation3 + $0xf0] sm:$0xff] %vm987_vm6, %v970_v41 }
 0x361   :  { %1516 = vst.msk [vmem:[#allocation3 + $0xf8] sm:$0xff] %vm793_vm4, %v1484_v10  ;;  %v2061_v10 = vadd.f32 %v3666_v8, %v2012_v40 }
 0x363   :  { %v2086_v41 = vpack.c.bf16 %v2061_v10, %v3623_v31  ;;  %v2574_v31 = vld [vmem:[%s3792_s5 + $0x8] sm:$0xff] }
 0x366   :  { %v1482_v50 = vpop.permute.xlu1 %1481 }
 0x367   :  { %v1065_v35 = vpop.permute.xlu0 %1064  ;;  %1515 = vst.msk [vmem:[#allocation3 + $0xe8] sm:$0xff] %vm793_vm4, %v1482_v50 }
 0x368   :  { %1099 = vst.msk [vmem:[#allocation3 + $0xe0] sm:$0xff] %vm1084_vm7, %v1065_v35 }
 0x369   :  { %1611 = vst.msk [vmem:[#allocation3 + $0xe8] sm:$0xff] %vm890_vm5, %v1578_v44 }
 0x36e   :  { %v1067_v45 = vpop.permute.xlu1 %1066  ;;  %v2019_v52 = vpop.f32.mrf.mxu2 }
 0x36f   :  { %1100 = vst.msk [vmem:[#allocation3 + $0xf0] sm:$0xff] %vm1084_vm7, %v1067_v45  ;;  %v1580_v25 = vpop.permute.xlu0 %1579  ;;  %v1833_v16 = vld [vmem:[#allocation3 + $0xe0] sm:$0xff]  ;;  %v2020_v28 = vadd.f32 %v3368_v14, %v2019_v52 }
 0x370   :  { %1612 = vst.msk [vmem:[#allocation3 + $0xf8] sm:$0xff] %vm890_vm5, %v1580_v25 }
 0x371   :  { %1708 = vst.msk [vmem:[#allocation3 + $0xf8] sm:$0xff] %vm987_vm6, %v1676_v46 }
 0x376   :  { %v1674_v47 = vpop.permute.xlu1 %1673  ;;  %v1835_v32 = vld [vmem:[#allocation3 + $0xf0] sm:$0xff]  ;;  %v2021_v55 = vpop.f32.mrf.mxu2 }
 0x377   :  { %1707 = vst.msk [vmem:[#allocation3 + $0xe8] sm:$0xff] %vm987_vm6, %v1674_v47  ;;  %v1851_v19 = vpack.c.bf16 %v1835_v32, %v1833_v16  ;;  %v1770_v37 = vpop.permute.xlu0 %1769  ;;  %v2022_v56 = vadd.f32 %v3368_v14, %v2021_v55 }
 0x378   :  { %1803 = vst.msk [vmem:[#allocation3 + $0xe8] sm:$0xff] %vm1084_vm7, %v1770_v37 }
 0x379   :  { %2028 = vmatmul.bf16.gmra.mxu2 %v1851_v19 }
 0x37d   :  { %v2068_v54 = vpop.f32.mrf.mxu3 }
 0x37e   :  { %v1772_v48 = vpop.permute.xlu1 %1771  ;;  %v2069_v38 = vadd.f32 %v2068_v54, %v2020_v28 }
 0x37f   :  { %1804 = vst.msk [vmem:[#allocation3 + $0xf8] sm:$0xff] %vm1084_vm7, %v1772_v48  ;;  %v1834_v23 = vld [vmem:[#allocation3 + $0xe8] sm:$0xff] }
 0x385   :  { %v2070_v57 = vpop.f32.mrf.mxu3 }
 0x386   :  { %v1836_v24 = vld [vmem:[#allocation3 + $0xf8] sm:$0xff]  ;;  %v2071_v33 = vadd.f32 %v2070_v57, %v2022_v56 }
 0x387   :  { %v1852_v12 = vpack.c.bf16 %v1836_v24, %v1834_v23 }
 0x388   :  { %v2088_v30 = vpack.c.bf16 %v2071_v33, %v2069_v38 }
 0x389   :  { %2077 = vmatmul.bf16.gmra.mxu3 %v1852_v12 }
 0x3b4   :  { %v2024_v3 = vpop.f32.mrf.mxu2 }
 0x3b5   :  { %v2025_v21 = vadd.f32 %v3368_v14, %v2024_v3 }
 0x3bc   :  { %v2026_v13 = vpop.f32.mrf.mxu2 }
 0x3bd   :  { %v2027_v18 = vadd.f32 %v3368_v14, %v2026_v13 }
 0x3c4   :  { %v2073_v59 = vpop.f32.mrf.mxu3 }
 0x3c5   :  { %v2074_v62 = vadd.f32 %v2073_v59, %v2025_v21 }
 0x3cc   :  { %v2075_v60 = vpop.f32.mrf.mxu3 }
 0x3cd   :  { %v2076_v27 = vadd.f32 %v2075_v60, %v2027_v18 }
 0x3cf   :  { %v2089_v34 = vpack.c.bf16 %v2076_v27, %v2074_v62 }
 0x3fc   :  { %v2029_v5 = vpop.f32.mrf.mxu2 }
 0x3fd   :  { %v2030_v9 = vadd.f32 %v3368_v14, %v2029_v5 }
 0x404   :  { %v2031_v53 = vpop.f32.mrf.mxu2 }
 0x405   :  { %v2032_v11 = vadd.f32 %v3368_v14, %v2031_v53  ;;  %v2573_v14 = vld [vmem:[%s3792_s5] sm:$0xff] }
 0x40c   :  { %v2078_v42 = vpop.f32.mrf.mxu3 }
 0x40d   :  { %v2079_v58 = vadd.f32 %v2078_v42, %v2030_v9 }
 0x414   :  { %v2080_v6 = vpop.f32.mrf.mxu3 }
 0x415   :  { %v2081_v20 = vadd.f32 %v2080_v6, %v2032_v11 }
 0x417   :  { %v2090_v29 = vpack.c.bf16 %v2081_v20, %v2079_v58 }
 0x419   :  { %2123 = vmatpush.bf16.msrb.mxu0 %v2090_v29 }
 0x41d   :  { %2124 = vmatpush.bf16.msrb.mxu0 %v2089_v34 }
 0x421   :  { %2125 = vmatpush.bf16.msrb.mxu0 %v2088_v30 }
 0x425   :  { %2126 = vmatpush.bf16.msrb.mxu0 %v2087_v61 }
 0x429   :  { %2127 = vmatpush.bf16.msrb.mxu0 %v2086_v41 }
 0x42d   :  { %2128 = vmatpush.bf16.msrb.mxu0 %v2085_v15 }
 0x431   :  { %2129 = vmatpush.bf16.msrb.mxu0 %v2084_v22 }
 0x435   :  { %2130 = vmatpush.bf16.msrb.mxu0 %v2083_v4 }
 0x438   :  { %2131 = vmatmul.bf16.vlgmr.msrb.gmra.mxu0 %v2573_v14 }
 0x448   :  { %2136 = vmatmul.bf16.gmra.mxu0 %v2574_v31 }
 0x458   :  { %2141 = vmatmul.bf16.gmra.mxu0 %v2575_v43 }
 0x468   :  { %2146 = vmatmul.bf16.gmra.mxu0 %v2576_v1 }
 0x4b5   :  { %v2132_v17 = vpop.f32.mrf.mxu0 }
 0x4b6   :  { %2273 = vrot.lane.b32.xlu1 %v2132_v17, %s2622_s13 }
 0x4bd   :  { %v2134_v63 = vpop.f32.mrf.mxu0 }
 0x4c5   :  { %v2137_v2 = vpop.f32.mrf.mxu0 }
 0x4cd   :  { %v2139_v4 = vpop.f32.mrf.mxu0 }
 0x4d5   :  { %v2142_v22 = vpop.f32.mrf.mxu0 }
 0x4d6   :  { %2156 = vrot.lane.b32.xlu2 %v2142_v22, %s2624_s19 }
 0x4dd   :  { %v2144_v0 = vpop.f32.mrf.mxu0 }
 0x4de   :  { %2158 = vrot.lane.b32.xlu0 %v2144_v0, %s2624_s19 }
 0x4e5   :  { %v2147_v15 = vpop.f32.mrf.mxu0 }
 0x4e6   :  { %2160 = vrot.lane.b32.xlu1 %v2147_v15, %s2624_s19 }
 0x4ed   :  { %v2149_v7 = vpop.f32.mrf.mxu0 }
 0x4ee   :  { %2162 = vrot.lane.b32.xlu2 %v2149_v7, %s2624_s19 }
 0x528   :  { %v3737_v50 = vpop.permute.xlu1 %2273 }
 0x530   :  { %v2157_v8 = vpop.permute.xlu2 %2156 }
 0x531   :  { %v2168_v26 = vmul.f32 %v2157_v8, %v2132_v17 }
 0x533   :  { %v2173_v44 = vsel %vm2172_vm8, %v2168_v26, -inf }
 0x534   :  { %2174 = vmax.xlane.f32.xlu0 %v2173_v44 }
 0x548   :  { %2277 = vrot.lane.b32.xlu0 %v2137_v2, %s2622_s13  ;;  %v2163_v32 = vpop.permute.xlu2 %2162 }
 0x549   :  { %v2171_v19 = vmul.f32 %v2163_v32, %v2139_v4 }
 0x54b   :  { %v2182_v37 = vsel %vm2172_vm8, %v2171_v19, -inf }
 0x550   :  { %2293 = vrot.lane.b32.xlu0 %v2132_v17, %s2625_s20  ;;  %v2159_v35 = vpop.permute.xlu0 %2158 }
 0x551   :  { %v2169_v45 = vmul.f32 %v2159_v35, %v2134_v63 }
 0x553   :  { %v2176_v46 = vsel %vm2172_vm8, %v2169_v45, -inf }
 0x554   :  { %2177 = vmax.xlane.f32.xlu1 %v2176_v46 }
 0x558   :  { %v2161_v25 = vpop.permute.xlu1 %2160 }
 0x559   :  { %v2170_v47 = vmul.f32 %v2161_v25, %v2137_v2 }
 0x55b   :  { %v2179_v16 = vsel %vm2172_vm8, %v2170_v47, -inf }
 0x55c   :  { %2180 = vmax.xlane.f32.xlu2 %v2179_v16 }
 0x564   :  { %2183 = vmax.xlane.f32.xlu2 %v2182_v37 }
 0x56d   :  { %2279 = vrot.lane.b32.xlu1 %v2139_v4, %s2622_s13 }
 0x57c   :  { %2275 = vrot.lane.b32.xlu2 %v2134_v63, %s2622_s13 }
 0x5a7   :  { %v2175_v48 = vpop.xlane.xlu0 %2174 }
 0x5a8   :  { %v2185_v23 = vsub.f32 %v2168_v26, %v2175_v48 }
 0x5aa   :  { %v2189_v24 = vmul.f32 1.442695, %v2185_v23 }
 0x5ac   :  { %2603 = vpow2.f32 %v2189_v24 }
 0x5b2   :  { %v2604_v12 = vpop.eup %2603 }
 0x5b3   :  { %v2197_v49 = vsel %vm2172_vm8, %v2604_v12, 0.0 }
 0x5b4   :  { %2198 = vadd.xlane.f32.xlu0 %v2197_v49 }
 0x5ba   :  { %v3761_v18 = vpop.permute.xlu0 %2277 }
 0x5c2   :  { %v2294_v58 = vpop.permute.xlu0 %2293 }
 0x5c7   :  { %v2178_v51 = vpop.xlane.xlu1 %2177 }
 0x5c8   :  { %v2186_v52 = vsub.f32 %v2169_v45, %v2178_v51 }
 0x5ca   :  { %v2191_v54 = vmul.f32 1.442695, %v2186_v52 }
 0x5cc   :  { %2605 = vpow2.f32 %v2191_v54 }
 0x5cf   :  { %v2181_v55 = vpop.xlane.xlu2 %2180 }
 0x5d0   :  { %v2187_v57 = vsub.f32 %v2170_v47, %v2181_v55 }
 0x5d2   :  { %v3746_v3 = vpop.eup %2605  ;;  %v2193_v59 = vmul.f32 1.442695, %v2187_v57 }
 0x5d3   :  { %v2200_v13 = vsel %vm2172_vm8, %v3746_v3, 0.0 }
 0x5d4   :  { %2607 = vpow2.f32 %v2193_v59  ;;  %2201 = vadd.xlane.f32.xlu1 %v2200_v13 }
 0x5d7   :  { %v2184_v60 = vpop.xlane.xlu2 %2183 }
 0x5d8   :  { %v2188_v5 = vsub.f32 %v2171_v19, %v2184_v60 }
 0x5da   :  { %v3750_v42 = vpop.eup %2607  ;;  %v2195_v53 = vmul.f32 1.442695, %v2188_v5 }
 0x5db   :  { %v2203_v9 = vsel %vm2172_vm8, %v3750_v42, 0.0 }
 0x5dc   :  { %2609 = vpow2.f32 %v2195_v53  ;;  %2204 = vadd.xlane.f32.xlu2 %v2203_v9 }
 0x5df   :  { %v3764_v10 = vpop.permute.xlu1 %2279  ;;  %v2276_v41 = vpop.permute.xlu2 %2275 }
 0x5e2   :  { %v3754_v11 = vpop.eup %2609 }
 0x5e3   :  { %v2206_v6 = vsel %vm2172_vm8, %v3754_v11, 0.0 }
 0x5e4   :  { %2207 = vadd.xlane.f32.xlu0 %v2206_v6 }
 0x5ed   :  { %2297 = vrot.lane.b32.xlu1 %v2137_v2, %s2625_s20 }
 0x5f4   :  { %2295 = vrot.lane.b32.xlu2 %v2134_v63, %s2625_s20 }
 0x5f8   :  { %2299 = vrot.lane.b32.xlu0 %v2139_v4, %s2625_s20 }
 0x627   :  { %v2199_v20 = vpop.xlane.xlu0 %2198 }
 0x628   :  { %2611 = vrcp.f32 %v2199_v20  ;;  %v2220_v56 = vand.u32 2147483648, %v2199_v20  ;;  %v2218_v28 = vand.u32 2147483647, %v2199_v20  ;;  %vm2214_vm10 = vweird.f32 %v2199_v20 }
 0x62a   :  { %v2221_v34 = vor.u32 1.1754944e-38, %v2220_v56  ;;  %vm2219_vm12 = vcmp.eq.f32.partialorder %v2218_v28, 8.507059e+37 }
 0x62e   :  { %v2612_v21 = vpop.eup %2611 }
 0x62f   :  { %v2210_v27 = vmul.f32 %v2612_v21, %v2199_v20  ;;  %vm2215_vm9 = vweird.f32 %v2612_v21 }
 0x630   :  { %vm2216_vm11 = vmor %vm2214_vm10, %vm2215_vm9 }
 0x631   :  { %v2211_v29 = vsub.f32 1.0, %v2210_v27 }
 0x633   :  { %v2212_v62 = vmul.f32 %v2612_v21, %v2211_v29 }
 0x635   :  { %v2213_v33 = vadd.f32 %v2612_v21, %v2212_v62 }
 0x637   :  { %v2217_v36 = vsel %vm2216_vm11, %v2612_v21, %v2213_v33 }
 0x638   :  { %v2222_v38 = vsel %vm2219_vm12, %v2221_v34, %v2217_v36 }
 0x639   :  { %v2223_v39 = vmul.f32 %v2604_v12, %v2222_v38 }
 0x63b   :  { %v2285_v30 = vmul.f32 %v3737_v50, %v2223_v39 }
 0x63d   :  { %v2289_v40 = vmul.f32 2.0, %v2285_v30 }
 0x63f   :  { %v2305_v61 = vadd.f32 %v2294_v58, %v2289_v40 }
 0x641   :  { %2309 = vst.msk [vmem:[%s3793_s6] sm:$0xff] %vm2172_vm8, %v2305_v61 }
 0x647   :  { %v2202_v14 = vpop.xlane.xlu1 %2201 }
 0x648   :  { %2613 = vrcp.f32 %v2202_v14  ;;  %v2235_v2 = vand.u32 2147483648, %v2202_v14  ;;  %v2233_v4 = vand.u32 2147483647, %v2202_v14  ;;  %vm2229_vm14 = vweird.f32 %v2202_v14 }
 0x64a   :  { %v2236_v15 = vor.u32 1.1754944e-38, %v2235_v2  ;;  %vm2234_vm0 = vcmp.eq.f32.partialorder %v2233_v4, 8.507059e+37 }
 0x64e   :  { %v2614_v31 = vpop.eup %2613 }
 0x64f   :  { %v2225_v43 = vmul.f32 %v2614_v31, %v2202_v14  ;;  %v2205_v1 = vpop.xlane.xlu2 %2204  ;;  %vm2230_vm13 = vweird.f32 %v2614_v31 }
 0x650   :  { %2615 = vrcp.f32 %v2205_v1  ;;  %vm2231_vm15 = vmor %vm2229_vm14, %vm2230_vm13  ;;  %v2250_v35 = vand.u32 2147483648, %v2205_v1  ;;  %v2248_v25 = vand.u32 2147483647, %v2205_v1  ;;  %vm2244_vm2 = vweird.f32 %v2205_v1 }
 0x651   :  { %v2226_v17 = vsub.f32 1.0, %v2225_v43 }
 0x652   :  { %v2251_v19 = vor.u32 1.1754944e-38, %v2250_v35  ;;  %vm2249_vm4 = vcmp.eq.f32.partialorder %v2248_v25, 8.507059e+37 }
 0x653   :  { %v2227_v63 = vmul.f32 %v2614_v31, %v2226_v17 }
 0x655   :  { %v2228_v22 = vadd.f32 %v2614_v31, %v2227_v63 }
 0x656   :  { %v2616_v0 = vpop.eup %2615 }
 0x657   :  { %v2240_v7 = vmul.f32 %v2616_v0, %v2205_v1  ;;  %v2208_v8 = vpop.xlane.xlu0 %2207  ;;  %v2232_v26 = vsel %vm2231_vm15, %v2614_v31, %v2228_v22  ;;  %vm2245_vm1 = vweird.f32 %v2616_v0  ;;  %v2296_v23 = vpop.permute.xlu2 %2295 }
 0x658   :  { %2617 = vrcp.f32 %v2208_v8  ;;  %v2237_v50 = vsel %vm2234_vm0, %v2236_v15, %v2232_v26  ;;  %vm2246_vm3 = vmor %vm2244_vm2, %vm2245_vm1  ;;  %v2265_v54 = vand.u32 2147483648, %v2208_v8  ;;  %v2263_v57 = vand.u32 2147483647, %v2208_v8 }
 0x659   :  { %v2241_v44 = vsub.f32 1.0, %v2240_v7  ;;  %v2238_v45 = vmul.f32 %v3746_v3, %v2237_v50  ;;  %vm2259_vm6 = vweird.f32 %v2208_v8 }
 0x65a   :  { %v2266_v60 = vor.u32 1.1754944e-38, %v2265_v54  ;;  %vm2264_vm9 = vcmp.eq.f32.partialorder %v2263_v57, 8.507059e+37 }
 0x65b   :  { %v2242_v46 = vmul.f32 %v2616_v0, %v2241_v44  ;;  %v2286_v47 = vmul.f32 %v2276_v41, %v2238_v45 }
 0x65d   :  { %v2243_v16 = vadd.f32 %v2616_v0, %v2242_v46  ;;  %v2290_v37 = vmul.f32 2.0, %v2286_v47 }
 0x65e   :  { %v2618_v32 = vpop.eup %2617 }
 0x65f   :  { %v2255_v48 = vmul.f32 %v2618_v32, %v2208_v8  ;;  %v2247_v24 = vsel %vm2246_vm3, %v2616_v0, %v2243_v16  ;;  %v2306_v12 = vadd.f32 %v2296_v23, %v2290_v37  ;;  %vm2260_vm5 = vweird.f32 %v2618_v32  ;;  %v2298_v5 = vpop.permute.xlu1 %2297 }
 0x660   :  { %v2252_v49 = vsel %vm2249_vm4, %v2251_v19, %v2247_v24  ;;  %vm2261_vm7 = vmor %vm2259_vm6, %vm2260_vm5 }
 0x661   :  { %v2256_v51 = vsub.f32 1.0, %v2255_v48  ;;  %v2253_v52 = vmul.f32 %v3750_v42, %v2252_v49  ;;  %2310 = vst.msk [vmem:[%s3793_s6 + $0x8] sm:$0xff] %vm2172_vm8, %v2306_v12 }
 0x663   :  { %v2257_v55 = vmul.f32 %v2618_v32, %v2256_v51  ;;  %v2287_v3 = vmul.f32 %v3761_v18, %v2253_v52 }
 0x665   :  { %v2291_v59 = vmul.f32 2.0, %v2287_v3  ;;  %v2258_v13 = vadd.f32 %v2618_v32, %v2257_v55 }
 0x667   :  { %v2307_v53 = vadd.f32 %v2298_v5, %v2291_v59  ;;  %v2262_v9 = vsel %vm2261_vm7, %v2618_v32, %v2258_v13 }
 0x668   :  { %v2267_v42 = vsel %vm2264_vm9, %v2266_v60, %v2262_v9 }
 0x669   :  { %2311 = vst.msk [vmem:[%s3793_s6 + $0x10] sm:$0xff] %vm2172_vm8, %v2307_v53  ;;  %v2268_v6 = vmul.f32 %v3754_v11, %v2267_v42 }
 0x66a   :  { %v2300_v20 = vpop.permute.xlu0 %2299 }
 0x66b   :  { %v2288_v58 = vmul.f32 %v3764_v10, %v2268_v6 }
 0x66d   :  { %v2292_v18 = vmul.f32 2.0, %v2288_v58 }
 0x66f   :  { %v2308_v21 = vadd.f32 %v2300_v20, %v2292_v18 }
 0x671   :  { %2312 = vst.msk [vmem:[%s3793_s6 + $0x18] sm:$0xff] %vm2172_vm8, %v2308_v21 }

</bundles_post_ra>
